<compile_context>
chip_gen: v6e
topology: v6e:2x2x1
jax: 0.10.0
libtpu: 0.0.40
codegen_flags: <defaults>
</compile_context>

<pallas_src>
import functools

import jax
import jax.numpy as jnp
from jax.experimental import pallas as pl
from jax.experimental.pallas import tpu as pltpu

N = 12        # number of neurons (module default)
INNER = 8     # timesteps handled per fori_loop iteration (sublane-aligned block)


def _recip(x):
    # EUP approximate reciprocal (+1 Newton-Raphson step -> ~f32 accurate).
    r = pl.reciprocal(x, approx=True)
    return r * (2.0 - x * r)


def glif_kernel(iext_ref, state0_ref, dparams_ref, weff_ref, spk_ref, state_ref):
    t_tile, n = spk_ref.shape

    # ---- initialize the VMEM-resident state block at the first time tile ----
    @pl.when(pl.program_id(0) == 0)
    def _init():
        state_ref[...] = state0_ref[...]

    # ---- loop-invariant loads, hoisted out of the time loop ----
    G_div_tau_m = dparams_ref[0:1, :]
    E_L         = dparams_ref[1:2, :]
    R_div_tau_m = dparams_ref[2:3, :]
    inv_tau_s   = dparams_ref[3:4, :]
    f_v         = dparams_ref[4:5, :]
    f_I         = dparams_ref[5:6, :]
    d_theta_s   = dparams_ref[6:7, :]
    one_m_b_s   = dparams_ref[7:8, :]
    a_v         = dparams_ref[8:9, :]
    b_v         = dparams_ref[9:10, :]
    theta_inf   = dparams_ref[10:11, :]
    delta_V     = dparams_ref[11:12, :]
    one_m_f_I   = dparams_ref[12:13, :]
    W = weff_ref[...]                                       # (N, N)

    # Identity mask: moves the (1,N) synaptic drive onto the sublane axis with
    # plain VPU ops + reductions (no MXU, no transpose op).  Exact in f32.
    rows = jax.lax.broadcasted_iota(jnp.int32, (n, n), 0)
    cols = jax.lax.broadcasted_iota(jnp.int32, (n, n), 1)
    eye = (rows == cols).astype(jnp.float32)

    # One-hot row selectors to pack INNER soft-spike rows into one (INNER, n)
    # block (single aligned store per INNER steps; pure VPU, no concat/relayout).
    blk_row = jax.lax.broadcasted_iota(jnp.int32, (INNER, 1), 0)
    row_sel = [(blk_row == k).astype(jnp.float32) for k in range(INNER)]

    zero = jnp.zeros((1, n), jnp.float32)

    st = state_ref[...]                                      # (5, N)
    carry0 = (st[0:1, :], st[1:2, :], st[2:3, :], st[3:4, :], st[4:5, :])

    def one_step(carry, I_ext):
        v, s, theta_s, theta_v, I_add = carry

        # I_syn = ((I_add + s)/2) @ W_eff  on the VPU/XLU.
        x = (I_add + s) * 0.5                                # (1, N)
        x_col = jnp.sum(x * eye, axis=1, keepdims=True)      # (N, 1) == x^T exactly
        I_syn = jnp.sum(x_col * W, axis=0, keepdims=True)    # (1, N)

        dv = G_div_tau_m * (E_L - v) + (I_syn + I_ext) * R_div_tau_m
        v_next = v + dv
        thresh = theta_s + theta_v
        spike = v_next >= thresh

        inv_thresh = _recip(thresh)
        inv_dv_max = _recip(thresh - E_L)
        gating = jnp.clip((v_next - theta_inf) * inv_thresh, 0.0, 1.0)
        ds = (-s + gating * jnp.clip(dv * inv_dv_max, 0.0, 1.0)) * inv_tau_s
        s_new = s + ds

        v_reset = E_L + f_v * (v - E_L) - delta_V
        v_new = jnp.where(spike, v_reset, v_next)

        theta_s_new = one_m_b_s * theta_s + jnp.where(spike, d_theta_s, zero)
        d_theta_v = a_v * (v_new - E_L) - b_v * (theta_v - theta_inf)
        theta_v_new = jnp.where(spike, theta_v, theta_v + d_theta_v)
        I_add_new = one_m_f_I * I_add + jnp.where(spike, f_I, zero)

        # soft spikes use the *updated* thresholds (matches the PyTorch order)
        soft = jax.nn.sigmoid(v_next - (theta_s_new + theta_v_new))
        return (v_new, s_new, theta_s_new, theta_v_new, I_add_new), soft

    def block(i, carry):
        base = pl.multiple_of(i * INNER, INNER)
        I_blk = iext_ref[pl.ds(base, INNER), :]              # (INNER, N) one load
        spk_blk = jnp.zeros((INNER, n), jnp.float32)
        c = carry
        for k in range(INNER):                               # static 8-step unroll
            c, soft = one_step(c, I_blk[k:k + 1, :])
            spk_blk = spk_blk + row_sel[k] * soft            # (INNER,1)*(1,N)
        spk_ref[pl.ds(base, INNER), :] = spk_blk             # one aligned store
        return c

    v, s, theta_s, theta_v, I_add = jax.lax.fori_loop(
        0, t_tile // INNER, block, carry0)

    # carry the state to the next time tile (and out to HBM at the end)
    state_ref[0:1, :] = v
    state_ref[1:2, :] = s
    state_ref[2:3, :] = theta_s
    state_ref[3:4, :] = theta_v
    state_ref[4:5, :] = I_add


@functools.partial(jax.jit, static_argnames=("t_tile",))
def glif_run(I_ext_seq, state0, params_raw, W_eff, *, t_tile=1024):
    """Run T GLIF steps in one fused kernel.

    I_ext_seq: (T, N) external currents, one row per step.
    Returns (soft_spiked (T, N), final_state (5, N)).
    """
    T, n = I_ext_seq.shape
    t_tile = min(t_tile, T)
    assert t_tile % INNER == 0, "t_tile must be a multiple of 8"
    assert T % t_tile == 0, "T must be a multiple of t_tile"

    (G, E_L, tau_m, tau_s, f_v, f_I, d_th_s, b_s, a_v, b_v,
     th_inf, delta_V, norm_R) = (params_raw[i] for i in range(13))
    # fold loop-invariant divides / subtracts once, outside the kernel
    dparams = jnp.stack([
        G / tau_m, E_L, norm_R / tau_m, 1.0 / tau_s, f_v, f_I, d_th_s,
        1.0 - b_s, a_v, b_v, th_inf, delta_V, 1.0 - f_I,
    ], axis=0).astype(jnp.float32)                           # (13, N)

    # VMEM is trivially sufficient: even t_tile=4096 -> (4096,12) f32 blocks
    # (~0.2 MiB double-buffered) on every TPU generation.
    return pl.pallas_call(
        glif_kernel,
        out_shape=(
            jax.ShapeDtypeStruct((T, n), jnp.float32),       # soft spikes
            jax.ShapeDtypeStruct((5, n), jnp.float32),       # final state
        ),
        grid_spec=pltpu.PrefetchScalarGridSpec(
            num_scalar_prefetch=0,
            grid=(T // t_tile,),
            in_specs=[
                pl.BlockSpec((t_tile, n), lambda t: (t, 0)),  # streamed I_ext
                pl.BlockSpec((5, n), lambda t: (0, 0)),       # initial state
                pl.BlockSpec((13, n), lambda t: (0, 0)),      # derived params
                pl.BlockSpec((n, n), lambda t: (0, 0)),       # W_eff
            ],
            out_specs=(
                pl.BlockSpec((t_tile, n), lambda t: (t, 0)),  # spikes tile
                pl.BlockSpec((5, n), lambda t: (0, 0)),       # resident state
            ),
        ),
        compiler_params=pltpu.CompilerParams(
            dimension_semantics=("arbitrary",)),
    )(I_ext_seq, state0, dparams, W_eff)


@jax.jit
def glif_reference(I_ext_seq, state0, params_raw, W_eff):
    """Pure-JAX reference mirroring the PyTorch forward exactly, scanned over T."""
    (G, E_L, tau_m, tau_s, f_v, f_I, d_th_s, b_s, a_v, b_v,
     th_inf, delta_V, norm_R) = (params_raw[i:i + 1] for i in range(13))

    def step(carry, I_row):
        v, s, theta_s, theta_v, I_add = carry
        I_ext = I_row[None, :]
        x = (I_add + s) / 2.0
        # f32-exact vector-matrix product (mirrors torch's float32 matmul).
        I_syn = jnp.sum(x[0][:, None] * W_eff, axis=0, keepdims=True)
        dv = (G * (E_L - v) + (I_syn + I_ext) * norm_R) / tau_m
        v_next = v + dv
        spiked = (v_next >= theta_s + theta_v).astype(jnp.float32)
        not_spiked = (spiked - 1.0) / -1.0
        gating = jnp.clip((v_next - th_inf) / (theta_s + theta_v), 0.0, 1.0)
        dv_max = theta_s + theta_v - E_L
        ds = (-s + gating * jnp.clip(dv / dv_max, 0.0, 1.0)) / tau_s
        s_new = s + ds
        v_reset = E_L + f_v * (v - E_L) - delta_V
        v_new = spiked * v_reset + not_spiked * v_next
        theta_s_new = (1.0 - b_s) * theta_s + spiked * d_th_s
        d_theta_v = a_v * (v_new - E_L) - b_v * (theta_v - th_inf)
        theta_v_new = theta_v + not_spiked * d_theta_v
        I_add_new = I_add - f_I * I_add + spiked * f_I
        soft = jax.nn.sigmoid(v_next - (theta_s_new + theta_v_new))
        return (v_new, s_new, theta_s_new, theta_v_new, I_add_new), soft[0]

    carry0 = tuple(state0[i:i + 1] for i in range(5))
    carry, softs = jax.lax.scan(step, carry0, I_ext_seq)
    return softs, jnp.concatenate(carry, axis=0)


def build_model(key):
    """Deterministic parameter / state construction mirroring __init__."""
    f32 = jnp.float32
    ones = jnp.ones((N,), f32)

    tau_m   = jnp.clip(ones * 2.75, 1.5, 8.0)
    tau_s   = jnp.clip(ones * 3.5, 1.0, 12.0)
    G       = jnp.clip(ones * 0.8, 0.01, 0.99)
    E_L     = jnp.clip(ones * -60.0, -80.0, -35.0)
    d_th_s  = jnp.clip(ones * 12.0, 6.0, 30.0)
    b_s     = jnp.clip(ones * 0.3, 0.01, 0.99)
    f_v     = jnp.clip(ones * 0.3, 0.01, 0.99)
    delta_V = jnp.clip(ones * 10.0, 1.0, 35.0)
    f_I     = jnp.clip(ones * 0.4, 0.01, 0.99)
    b_v     = jnp.clip(ones * 0.5, 0.01, 0.99)
    a_v     = jnp.clip(ones * 0.5, 0.01, 0.99)
    th_inf  = jnp.clip(ones * -10.0, -25.0, 0.0)

    theta_max = d_th_s / b_s - a_v / b_v * E_L + delta_V
    norm_R = 1.1 * theta_max

    w_mean, w_var = 0.2, 0.15
    k_w, _ = jax.random.split(key)
    w = jax.random.uniform(k_w, (N, N), f32,
                           minval=w_mean - w_var, maxval=w_mean + w_var)

    # first half excitatory (+1), second half inhibitory (-1); row i signed by nt[i]
    nt = jnp.concatenate([jnp.ones((N // 2,), f32), -jnp.ones((N - N // 2,), f32)])
    neuron_types = nt[:, None] * jnp.ones((N, N), f32)
    self_rec_mask = jnp.ones((N, N), f32) - jnp.eye(N, dtype=f32)
    W_eff = self_rec_mask * (w * neuron_types)

    params_raw = jnp.stack([G, E_L, tau_m, tau_s, f_v, f_I, d_th_s, b_s,
                            a_v, b_v, th_inf, delta_V, norm_R], axis=0)  # (13, N)

    state0 = jnp.stack([E_L,                      # v
                        jnp.zeros((N,), f32),     # s
                        d_th_s,                   # theta_s
                        delta_V,                  # theta_v
                        jnp.zeros((N,), f32)],    # I_additive
                       axis=0)                    # (5, N)
    return params_raw, state0, W_eff


if __name__ == "__main__":
    key = jax.random.PRNGKey(0)
    params_raw, state0, W_eff = build_model(key)

    T = 64
    k_in = jax.random.fold_in(key, 1)
    I_ext_seq = jax.random.uniform(k_in, (T, N), jnp.float32, minval=0.0, maxval=1.0)

    soft_spk, state_final = glif_run(I_ext_seq, state0, params_raw, W_eff, t_tile=64)
    jax.block_until_ready((soft_spk, state_final))

    soft_ref, state_final_ref = glif_reference(I_ext_seq, state0, params_raw, W_eff)
    assert soft_spk.shape == (T, N) and state_final.shape == (5, N)
    assert jnp.allclose(soft_spk, soft_ref, atol=2e-3, rtol=2e-3), "soft spikes mismatch"
    assert jnp.allclose(state_final, state_final_ref, atol=2e-3, rtol=2e-3), "state mismatch"

    print("KERNEL_OK")
</pallas_src>

<mosaic_0001>
module attributes {stable_mosaic.version = 11 : i64} {
  func.func @glif_kernel(%arg0: i32, %arg1: memref<64x12xf32, #tpu.memory_space<vmem>>, %arg2: memref<5x12xf32, #tpu.memory_space<vmem>>, %arg3: memref<13x12xf32, #tpu.memory_space<vmem>>, %arg4: memref<12x12xf32, #tpu.memory_space<vmem>>, %arg5: memref<64x12xf32, #tpu.memory_space<vmem>>, %arg6: memref<5x12xf32, #tpu.memory_space<vmem>>) attributes {dimension_semantics = [#tpu.dimension_semantics<arbitrary>], iteration_bounds = array<i64: 1>, scalar_prefetch = 0 : i64, scratch_operands = 0 : i64, tpu.core_type = #tpu.core_type<tc>, window_params = [{transform_indices = @transform_0, window_bounds = array<i64: 64, 12>}, {pipeline_mode = #tpu.pipeline_mode<synchronous>, transform_indices = @transform_1, window_bounds = array<i64: 5, 12>}, {pipeline_mode = #tpu.pipeline_mode<synchronous>, transform_indices = @transform_2, window_bounds = array<i64: 13, 12>}, {pipeline_mode = #tpu.pipeline_mode<synchronous>, transform_indices = @transform_3, window_bounds = array<i64: 12, 12>}, {transform_indices = @transform_4, window_bounds = array<i64: 64, 12>}, {pipeline_mode = #tpu.pipeline_mode<synchronous>, transform_indices = @transform_5, window_bounds = array<i64: 5, 12>}]} {
    %c0_i32 = arith.constant 0 : i32
    %0 = arith.cmpi eq, %arg0, %c0_i32 : i32
    %1 = arith.extui %0 : i1 to i32
    %c0_i32_0 = arith.constant 0 : i32
    %2 = arith.cmpi ne, %1, %c0_i32_0 : i32
    scf.if %2 {
      %c0_32 = arith.constant 0 : index
      %c0_33 = arith.constant 0 : index
      %69 = vector.load %arg2[%c0_32, %c0_33] : memref<5x12xf32, #tpu.memory_space<vmem>>, vector<5x12xf32>
      %c0_34 = arith.constant 0 : index
      %c0_35 = arith.constant 0 : index
      %70 = vector.load %arg6[%c0_34, %c0_35] : memref<5x12xf32, #tpu.memory_space<vmem>>, vector<5x12xf32>
      tpu.vector_store %arg6[%c0_34, %c0_35], %69 {strides = array<i32>} : memref<5x12xf32, #tpu.memory_space<vmem>>, vector<5x12xf32>,
    } else {
    }
    %c0 = arith.constant 0 : index
    %c0_1 = arith.constant 0 : index
    %3 = vector.load %arg3[%c0, %c0_1] : memref<13x12xf32, #tpu.memory_space<vmem>>, vector<1x12xf32>
    %c1 = arith.constant 1 : index
    %c0_2 = arith.constant 0 : index
    %4 = vector.load %arg3[%c1, %c0_2] : memref<13x12xf32, #tpu.memory_space<vmem>>, vector<1x12xf32>
    %c2 = arith.constant 2 : index
    %c0_3 = arith.constant 0 : index
    %5 = vector.load %arg3[%c2, %c0_3] : memref<13x12xf32, #tpu.memory_space<vmem>>, vector<1x12xf32>
    %c3 = arith.constant 3 : index
    %c0_4 = arith.constant 0 : index
    %6 = vector.load %arg3[%c3, %c0_4] : memref<13x12xf32, #tpu.memory_space<vmem>>, vector<1x12xf32>
    %c4 = arith.constant 4 : index
    %c0_5 = arith.constant 0 : index
    %7 = vector.load %arg3[%c4, %c0_5] : memref<13x12xf32, #tpu.memory_space<vmem>>, vector<1x12xf32>
    %c5 = arith.constant 5 : index
    %c0_6 = arith.constant 0 : index
    %8 = vector.load %arg3[%c5, %c0_6] : memref<13x12xf32, #tpu.memory_space<vmem>>, vector<1x12xf32>
    %c6 = arith.constant 6 : index
    %c0_7 = arith.constant 0 : index
    %9 = vector.load %arg3[%c6, %c0_7] : memref<13x12xf32, #tpu.memory_space<vmem>>, vector<1x12xf32>
    %c7 = arith.constant 7 : index
    %c0_8 = arith.constant 0 : index
    %10 = vector.load %arg3[%c7, %c0_8] : memref<13x12xf32, #tpu.memory_space<vmem>>, vector<1x12xf32>
    %c8 = arith.constant 8 : index
    %c0_9 = arith.constant 0 : index
    %11 = vector.load %arg3[%c8, %c0_9] : memref<13x12xf32, #tpu.memory_space<vmem>>, vector<1x12xf32>
    %c9 = arith.constant 9 : index
    %c0_10 = arith.constant 0 : index
    %12 = vector.load %arg3[%c9, %c0_10] : memref<13x12xf32, #tpu.memory_space<vmem>>, vector<1x12xf32>
    %c10 = arith.constant 10 : index
    %c0_11 = arith.constant 0 : index
    %13 = vector.load %arg3[%c10, %c0_11] : memref<13x12xf32, #tpu.memory_space<vmem>>, vector<1x12xf32>
    %c11 = arith.constant 11 : index
    %c0_12 = arith.constant 0 : index
    %14 = vector.load %arg3[%c11, %c0_12] : memref<13x12xf32, #tpu.memory_space<vmem>>, vector<1x12xf32>
    %c12 = arith.constant 12 : index
    %c0_13 = arith.constant 0 : index
    %15 = vector.load %arg3[%c12, %c0_13] : memref<13x12xf32, #tpu.memory_space<vmem>>, vector<1x12xf32>
    %c0_14 = arith.constant 0 : index
    %c0_15 = arith.constant 0 : index
    %16 = vector.load %arg4[%c0_14, %c0_15] : memref<12x12xf32, #tpu.memory_space<vmem>>, vector<12x12xf32>
    %17 = tpu.iota {dimensions = array<i32: 0>} : vector<12x12xi32>
    %18 = tpu.iota {dimensions = array<i32: 1>} : vector<12x12xi32>
    %19 = arith.cmpi eq, %17, %18 : vector<12x12xi32>
    %20 = arith.extui %19 : vector<12x12xi1> to vector<12x12xi32>
    %21 = arith.sitofp %20 : vector<12x12xi32> to vector<12x12xf32>
    %22 = tpu.iota {dimensions = array<i32: 0>} : vector<8x1xi32>
    %c0_i32_16 = arith.constant 0 : i32
    %23 = vector.broadcast %c0_i32_16 : i32 to vector<8x1xi32>
    %24 = arith.cmpi eq, %22, %23 : vector<8x1xi32>
    %25 = arith.extui %24 : vector<8x1xi1> to vector<8x1xi32>
    %26 = arith.sitofp %25 : vector<8x1xi32> to vector<8x1xf32>
    %c1_i32 = arith.constant 1 : i32
    %27 = vector.broadcast %c1_i32 : i32 to vector<8x1xi32>
    %28 = arith.cmpi eq, %22, %27 : vector<8x1xi32>
    %29 = arith.extui %28 : vector<8x1xi1> to vector<8x1xi32>
    %30 = arith.sitofp %29 : vector<8x1xi32> to vector<8x1xf32>
    %c2_i32 = arith.constant 2 : i32
    %31 = vector.broadcast %c2_i32 : i32 to vector<8x1xi32>
    %32 = arith.cmpi eq, %22, %31 : vector<8x1xi32>
    %33 = arith.extui %32 : vector<8x1xi1> to vector<8x1xi32>
    %34 = arith.sitofp %33 : vector<8x1xi32> to vector<8x1xf32>
    %c3_i32 = arith.constant 3 : i32
    %35 = vector.broadcast %c3_i32 : i32 to vector<8x1xi32>
    %36 = arith.cmpi eq, %22, %35 : vector<8x1xi32>
    %37 = arith.extui %36 : vector<8x1xi1> to vector<8x1xi32>
    %38 = arith.sitofp %37 : vector<8x1xi32> to vector<8x1xf32>
    %c4_i32 = arith.constant 4 : i32
    %39 = vector.broadcast %c4_i32 : i32 to vector<8x1xi32>
    %40 = arith.cmpi eq, %22, %39 : vector<8x1xi32>
    %41 = arith.extui %40 : vector<8x1xi1> to vector<8x1xi32>
    %42 = arith.sitofp %41 : vector<8x1xi32> to vector<8x1xf32>
    %c5_i32 = arith.constant 5 : i32
    %43 = vector.broadcast %c5_i32 : i32 to vector<8x1xi32>
    %44 = arith.cmpi eq, %22, %43 : vector<8x1xi32>
    %45 = arith.extui %44 : vector<8x1xi1> to vector<8x1xi32>
    %46 = arith.sitofp %45 : vector<8x1xi32> to vector<8x1xf32>
    %c6_i32 = arith.constant 6 : i32
    %47 = vector.broadcast %c6_i32 : i32 to vector<8x1xi32>
    %48 = arith.cmpi eq, %22, %47 : vector<8x1xi32>
    %49 = arith.extui %48 : vector<8x1xi1> to vector<8x1xi32>
    %50 = arith.sitofp %49 : vector<8x1xi32> to vector<8x1xf32>
    %c7_i32 = arith.constant 7 : i32
    %51 = vector.broadcast %c7_i32 : i32 to vector<8x1xi32>
    %52 = arith.cmpi eq, %22, %51 : vector<8x1xi32>
    %53 = arith.extui %52 : vector<8x1xi1> to vector<8x1xi32>
    %54 = arith.sitofp %53 : vector<8x1xi32> to vector<8x1xf32>
    %cst = arith.constant 0.000000e+00 : f32
    %55 = vector.broadcast %cst : f32 to vector<1x12xf32>
    %c0_17 = arith.constant 0 : index
    %c0_18 = arith.constant 0 : index
    %56 = vector.load %arg6[%c0_17, %c0_18] : memref<5x12xf32, #tpu.memory_space<vmem>>, vector<5x12xf32>
    %57 = vector.extract_strided_slice %56 {offsets = [0, 0], sizes = [1, 12], strides = [1, 1]} : vector<5x12xf32> to vector<1x12xf32>
    %58 = vector.extract_strided_slice %56 {offsets = [1, 0], sizes = [1, 12], strides = [1, 1]} : vector<5x12xf32> to vector<1x12xf32>
    %59 = vector.extract_strided_slice %56 {offsets = [2, 0], sizes = [1, 12], strides = [1, 1]} : vector<5x12xf32> to vector<1x12xf32>
    %60 = vector.extract_strided_slice %56 {offsets = [3, 0], sizes = [1, 12], strides = [1, 1]} : vector<5x12xf32> to vector<1x12xf32>
    %61 = vector.extract_strided_slice %56 {offsets = [4, 0], sizes = [1, 12], strides = [1, 1]} : vector<5x12xf32> to vector<1x12xf32>
    %c0_i32_19 = arith.constant 0 : i32
    %c8_i32 = arith.constant 8 : i32
    %62 = arith.addi %c0_i32_19, %c8_i32 : i32
    %c1_i32_20 = arith.constant 1 : i32
    %63:5 = scf.for %arg7 = %c0_i32_19 to %62 step %c1_i32_20 iter_args(%arg8 = %57, %arg9 = %58, %arg10 = %59, %arg11 = %60, %arg12 = %61) -> (vector<1x12xf32>, vector<1x12xf32>, vector<1x12xf32>, vector<1x12xf32>, vector<1x12xf32>)  : i32 {
      %c8_i32_32 = arith.constant 8 : i32
      %69 = arith.muli %arg7, %c8_i32_32 : i32
      %70 = tpu.assume_multiple %69, 8 : i32
      %71 = arith.index_cast %70 : i32 to index
      %c0_33 = arith.constant 0 : index
      %72 = vector.load %arg1[%71, %c0_33] : memref<64x12xf32, #tpu.memory_space<vmem>>, vector<8x12xf32>
      %cst_34 = arith.constant 0.000000e+00 : f32
      %73 = vector.broadcast %cst_34 : f32 to vector<8x12xf32>
      %74 = vector.extract_strided_slice %72 {offsets = [0, 0], sizes = [1, 12], strides = [1, 1]} : vector<8x12xf32> to vector<1x12xf32>
      %75 = arith.addf %arg12, %arg9 : vector<1x12xf32>
      %cst_35 = arith.constant 5.000000e-01 : f32
      %76 = vector.broadcast %cst_35 : f32 to vector<1x12xf32>
      %77 = arith.mulf %75, %76 : vector<1x12xf32>
      %78 = vector.broadcast %77 : vector<1x12xf32> to vector<12x12xf32>
      %79 = arith.mulf %78, %21 : vector<12x12xf32>
      %cst_36 = arith.constant dense<0.000000e+00> : vector<12xf32>
      %80 = vector.multi_reduction <add>, %79, %cst_36 [1] : vector<12x12xf32> to vector<12xf32>
      %81 = vector.shape_cast %80 : vector<12xf32> to vector<12x1xf32>
      %82 = vector.broadcast %81 : vector<12x1xf32> to vector<12x12xf32>
      %83 = arith.mulf %82, %16 : vector<12x12xf32>
      %cst_37 = arith.constant dense<0.000000e+00> : vector<12xf32>
      %84 = vector.multi_reduction <add>, %83, %cst_37 [0] : vector<12x12xf32> to vector<12xf32>
      %85 = vector.shape_cast %84 : vector<12xf32> to vector<1x12xf32>
      %86 = arith.subf %4, %arg8 : vector<1x12xf32>
      %87 = arith.mulf %3, %86 : vector<1x12xf32>
      %88 = arith.addf %85, %74 : vector<1x12xf32>
      %89 = arith.mulf %88, %5 : vector<1x12xf32>
      %90 = arith.addf %87, %89 : vector<1x12xf32>
      %91 = arith.addf %arg8, %90 : vector<1x12xf32>
      %92 = arith.addf %arg10, %arg11 : vector<1x12xf32>
      %93 = arith.cmpf oge, %91, %92 : vector<1x12xf32>
      %94 = tpu.reciprocal %92 {approx = true} : vector<1x12xf32> -> vector<1x12xf32>
      %95 = arith.mulf %92, %94 : vector<1x12xf32>
      %cst_38 = arith.constant 2.000000e+00 : f32
      %96 = vector.broadcast %cst_38 : f32 to vector<1x12xf32>
      %97 = arith.subf %96, %95 : vector<1x12xf32>
      %98 = arith.mulf %94, %97 : vector<1x12xf32>
      %99 = arith.subf %92, %4 : vector<1x12xf32>
      %100 = tpu.reciprocal %99 {approx = true} : vector<1x12xf32> -> vector<1x12xf32>
      %101 = arith.mulf %99, %100 : vector<1x12xf32>
      %cst_39 = arith.constant 2.000000e+00 : f32
      %102 = vector.broadcast %cst_39 : f32 to vector<1x12xf32>
      %103 = arith.subf %102, %101 : vector<1x12xf32>
      %104 = arith.mulf %100, %103 : vector<1x12xf32>
      %105 = arith.subf %91, %13 : vector<1x12xf32>
      %106 = arith.mulf %105, %98 : vector<1x12xf32>
      %cst_40 = arith.constant 0.000000e+00 : f32
      %cst_41 = arith.constant 1.000000e+00 : f32
      %107 = vector.broadcast %cst_40 : f32 to vector<1x12xf32>
      %108 = arith.maximumf %107, %106 : vector<1x12xf32>
      %109 = vector.broadcast %cst_41 : f32 to vector<1x12xf32>
      %110 = arith.minimumf %109, %108 : vector<1x12xf32>
      %cst_42 = arith.constant 0.000000e+00 : f32
      %111 = vector.broadcast %cst_42 : f32 to vector<1x12xf32>
      %112 = arith.subf %111, %arg9 : vector<1x12xf32>
      %113 = arith.mulf %90, %104 : vector<1x12xf32>
      %cst_43 = arith.constant 0.000000e+00 : f32
      %cst_44 = arith.constant 1.000000e+00 : f32
      %114 = vector.broadcast %cst_43 : f32 to vector<1x12xf32>
      %115 = arith.maximumf %114, %113 : vector<1x12xf32>
      %116 = vector.broadcast %cst_44 : f32 to vector<1x12xf32>
      %117 = arith.minimumf %116, %115 : vector<1x12xf32>
      %118 = arith.mulf %110, %117 : vector<1x12xf32>
      %119 = arith.addf %112, %118 : vector<1x12xf32>
      %120 = arith.mulf %119, %6 : vector<1x12xf32>
      %121 = arith.addf %arg9, %120 : vector<1x12xf32>
      %122 = arith.subf %arg8, %4 : vector<1x12xf32>
      %123 = arith.mulf %7, %122 : vector<1x12xf32>
      %124 = arith.addf %4, %123 : vector<1x12xf32>
      %125 = arith.subf %124, %14 : vector<1x12xf32>
      %126 = arith.select %93, %125, %91 : vector<1x12xi1>, vector<1x12xf32>
      %127 = arith.mulf %10, %arg10 : vector<1x12xf32>
      %128 = arith.select %93, %9, %55 : vector<1x12xi1>, vector<1x12xf32>
      %129 = arith.addf %127, %128 : vector<1x12xf32>
      %130 = arith.subf %126, %4 : vector<1x12xf32>
      %131 = arith.mulf %11, %130 : vector<1x12xf32>
      %132 = arith.subf %arg11, %13 : vector<1x12xf32>
      %133 = arith.mulf %12, %132 : vector<1x12xf32>
      %134 = arith.subf %131, %133 : vector<1x12xf32>
      %135 = arith.addf %arg11, %134 : vector<1x12xf32>
      %136 = arith.select %93, %arg11, %135 : vector<1x12xi1>, vector<1x12xf32>
      %137 = arith.mulf %15, %arg12 : vector<1x12xf32>
      %138 = arith.select %93, %8, %55 : vector<1x12xi1>, vector<1x12xf32>
      %139 = arith.addf %137, %138 : vector<1x12xf32>
      %140 = arith.addf %129, %136 : vector<1x12xf32>
      %141 = arith.subf %91, %140 : vector<1x12xf32>
      %142 = arith.negf %141 : vector<1x12xf32>
      %143 = math.exp %142 : vector<1x12xf32>
      %cst_45 = arith.constant 1.000000e+00 : f32
      %144 = vector.broadcast %cst_45 : f32 to vector<1x12xf32>
      %145 = arith.addf %144, %143 : vector<1x12xf32>
      %146 = arith.divf %144, %145 : vector<1x12xf32>
      %147 = vector.broadcast %26 : vector<8x1xf32> to vector<8x12xf32>
      %148 = vector.broadcast %146 : vector<1x12xf32> to vector<8x12xf32>
      %149 = arith.mulf %147, %148 : vector<8x12xf32>
      %150 = arith.addf %73, %149 : vector<8x12xf32>
      %151 = vector.extract_strided_slice %72 {offsets = [1, 0], sizes = [1, 12], strides = [1, 1]} : vector<8x12xf32> to vector<1x12xf32>
      %152 = arith.addf %139, %121 : vector<1x12xf32>
      %cst_46 = arith.constant 5.000000e-01 : f32
      %153 = vector.broadcast %cst_46 : f32 to vector<1x12xf32>
      %154 = arith.mulf %152, %153 : vector<1x12xf32>
      %155 = vector.broadcast %154 : vector<1x12xf32> to vector<12x12xf32>
      %156 = arith.mulf %155, %21 : vector<12x12xf32>
      %cst_47 = arith.constant dense<0.000000e+00> : vector<12xf32>
      %157 = vector.multi_reduction <add>, %156, %cst_47 [1] : vector<12x12xf32> to vector<12xf32>
      %158 = vector.shape_cast %157 : vector<12xf32> to vector<12x1xf32>
      %159 = vector.broadcast %158 : vector<12x1xf32> to vector<12x12xf32>
      %160 = arith.mulf %159, %16 : vector<12x12xf32>
      %cst_48 = arith.constant dense<0.000000e+00> : vector<12xf32>
      %161 = vector.multi_reduction <add>, %160, %cst_48 [0] : vector<12x12xf32> to vector<12xf32>
      %162 = vector.shape_cast %161 : vector<12xf32> to vector<1x12xf32>
      %163 = arith.subf %4, %126 : vector<1x12xf32>
      %164 = arith.mulf %3, %163 : vector<1x12xf32>
      %165 = arith.addf %162, %151 : vector<1x12xf32>
      %166 = arith.mulf %165, %5 : vector<1x12xf32>
      %167 = arith.addf %164, %166 : vector<1x12xf32>
      %168 = arith.addf %126, %167 : vector<1x12xf32>
      %169 = arith.addf %129, %136 : vector<1x12xf32>
      %170 = arith.cmpf oge, %168, %169 : vector<1x12xf32>
      %171 = tpu.reciprocal %169 {approx = true} : vector<1x12xf32> -> vector<1x12xf32>
      %172 = arith.mulf %169, %171 : vector<1x12xf32>
      %cst_49 = arith.constant 2.000000e+00 : f32
      %173 = vector.broadcast %cst_49 : f32 to vector<1x12xf32>
      %174 = arith.subf %173, %172 : vector<1x12xf32>
      %175 = arith.mulf %171, %174 : vector<1x12xf32>
      %176 = arith.subf %169, %4 : vector<1x12xf32>
      %177 = tpu.reciprocal %176 {approx = true} : vector<1x12xf32> -> vector<1x12xf32>
      %178 = arith.mulf %176, %177 : vector<1x12xf32>
      %cst_50 = arith.constant 2.000000e+00 : f32
      %179 = vector.broadcast %cst_50 : f32 to vector<1x12xf32>
      %180 = arith.subf %179, %178 : vector<1x12xf32>
      %181 = arith.mulf %177, %180 : vector<1x12xf32>
      %182 = arith.subf %168, %13 : vector<1x12xf32>
      %183 = arith.mulf %182, %175 : vector<1x12xf32>
      %cst_51 = arith.constant 0.000000e+00 : f32
      %cst_52 = arith.constant 1.000000e+00 : f32
      %184 = vector.broadcast %cst_51 : f32 to vector<1x12xf32>
      %185 = arith.maximumf %184, %183 : vector<1x12xf32>
      %186 = vector.broadcast %cst_52 : f32 to vector<1x12xf32>
      %187 = arith.minimumf %186, %185 : vector<1x12xf32>
      %cst_53 = arith.constant 0.000000e+00 : f32
      %188 = vector.broadcast %cst_53 : f32 to vector<1x12xf32>
      %189 = arith.subf %188, %121 : vector<1x12xf32>
      %190 = arith.mulf %167, %181 : vector<1x12xf32>
      %cst_54 = arith.constant 0.000000e+00 : f32
      %cst_55 = arith.constant 1.000000e+00 : f32
      %191 = vector.broadcast %cst_54 : f32 to vector<1x12xf32>
      %192 = arith.maximumf %191, %190 : vector<1x12xf32>
      %193 = vector.broadcast %cst_55 : f32 to vector<1x12xf32>
      %194 = arith.minimumf %193, %192 : vector<1x12xf32>
      %195 = arith.mulf %187, %194 : vector<1x12xf32>
      %196 = arith.addf %189, %195 : vector<1x12xf32>
      %197 = arith.mulf %196, %6 : vector<1x12xf32>
      %198 = arith.addf %121, %197 : vector<1x12xf32>
      %199 = arith.subf %126, %4 : vector<1x12xf32>
      %200 = arith.mulf %7, %199 : vector<1x12xf32>
      %201 = arith.addf %4, %200 : vector<1x12xf32>
      %202 = arith.subf %201, %14 : vector<1x12xf32>
      %203 = arith.select %170, %202, %168 : vector<1x12xi1>, vector<1x12xf32>
      %204 = arith.mulf %10, %129 : vector<1x12xf32>
      %205 = arith.select %170, %9, %55 : vector<1x12xi1>, vector<1x12xf32>
      %206 = arith.addf %204, %205 : vector<1x12xf32>
      %207 = arith.subf %203, %4 : vector<1x12xf32>
      %208 = arith.mulf %11, %207 : vector<1x12xf32>
      %209 = arith.subf %136, %13 : vector<1x12xf32>
      %210 = arith.mulf %12, %209 : vector<1x12xf32>
      %211 = arith.subf %208, %210 : vector<1x12xf32>
      %212 = arith.addf %136, %211 : vector<1x12xf32>
      %213 = arith.select %170, %136, %212 : vector<1x12xi1>, vector<1x12xf32>
      %214 = arith.mulf %15, %139 : vector<1x12xf32>
      %215 = arith.select %170, %8, %55 : vector<1x12xi1>, vector<1x12xf32>
      %216 = arith.addf %214, %215 : vector<1x12xf32>
      %217 = arith.addf %206, %213 : vector<1x12xf32>
      %218 = arith.subf %168, %217 : vector<1x12xf32>
      %219 = arith.negf %218 : vector<1x12xf32>
      %220 = math.exp %219 : vector<1x12xf32>
      %cst_56 = arith.constant 1.000000e+00 : f32
      %221 = vector.broadcast %cst_56 : f32 to vector<1x12xf32>
      %222 = arith.addf %221, %220 : vector<1x12xf32>
      %223 = arith.divf %221, %222 : vector<1x12xf32>
      %224 = vector.broadcast %30 : vector<8x1xf32> to vector<8x12xf32>
      %225 = vector.broadcast %223 : vector<1x12xf32> to vector<8x12xf32>
      %226 = arith.mulf %224, %225 : vector<8x12xf32>
      %227 = arith.addf %150, %226 : vector<8x12xf32>
      %228 = vector.extract_strided_slice %72 {offsets = [2, 0], sizes = [1, 12], strides = [1, 1]} : vector<8x12xf32> to vector<1x12xf32>
      %229 = arith.addf %216, %198 : vector<1x12xf32>
      %cst_57 = arith.constant 5.000000e-01 : f32
      %230 = vector.broadcast %cst_57 : f32 to vector<1x12xf32>
      %231 = arith.mulf %229, %230 : vector<1x12xf32>
      %232 = vector.broadcast %231 : vector<1x12xf32> to vector<12x12xf32>
      %233 = arith.mulf %232, %21 : vector<12x12xf32>
      %cst_58 = arith.constant dense<0.000000e+00> : vector<12xf32>
      %234 = vector.multi_reduction <add>, %233, %cst_58 [1] : vector<12x12xf32> to vector<12xf32>
      %235 = vector.shape_cast %234 : vector<12xf32> to vector<12x1xf32>
      %236 = vector.broadcast %235 : vector<12x1xf32> to vector<12x12xf32>
      %237 = arith.mulf %236, %16 : vector<12x12xf32>
      %cst_59 = arith.constant dense<0.000000e+00> : vector<12xf32>
      %238 = vector.multi_reduction <add>, %237, %cst_59 [0] : vector<12x12xf32> to vector<12xf32>
      %239 = vector.shape_cast %238 : vector<12xf32> to vector<1x12xf32>
      %240 = arith.subf %4, %203 : vector<1x12xf32>
      %241 = arith.mulf %3, %240 : vector<1x12xf32>
      %242 = arith.addf %239, %228 : vector<1x12xf32>
      %243 = arith.mulf %242, %5 : vector<1x12xf32>
      %244 = arith.addf %241, %243 : vector<1x12xf32>
      %245 = arith.addf %203, %244 : vector<1x12xf32>
      %246 = arith.addf %206, %213 : vector<1x12xf32>
      %247 = arith.cmpf oge, %245, %246 : vector<1x12xf32>
      %248 = tpu.reciprocal %246 {approx = true} : vector<1x12xf32> -> vector<1x12xf32>
      %249 = arith.mulf %246, %248 : vector<1x12xf32>
      %cst_60 = arith.constant 2.000000e+00 : f32
      %250 = vector.broadcast %cst_60 : f32 to vector<1x12xf32>
      %251 = arith.subf %250, %249 : vector<1x12xf32>
      %252 = arith.mulf %248, %251 : vector<1x12xf32>
      %253 = arith.subf %246, %4 : vector<1x12xf32>
      %254 = tpu.reciprocal %253 {approx = true} : vector<1x12xf32> -> vector<1x12xf32>
      %255 = arith.mulf %253, %254 : vector<1x12xf32>
      %cst_61 = arith.constant 2.000000e+00 : f32
      %256 = vector.broadcast %cst_61 : f32 to vector<1x12xf32>
      %257 = arith.subf %256, %255 : vector<1x12xf32>
      %258 = arith.mulf %254, %257 : vector<1x12xf32>
      %259 = arith.subf %245, %13 : vector<1x12xf32>
      %260 = arith.mulf %259, %252 : vector<1x12xf32>
      %cst_62 = arith.constant 0.000000e+00 : f32
      %cst_63 = arith.constant 1.000000e+00 : f32
      %261 = vector.broadcast %cst_62 : f32 to vector<1x12xf32>
      %262 = arith.maximumf %261, %260 : vector<1x12xf32>
      %263 = vector.broadcast %cst_63 : f32 to vector<1x12xf32>
      %264 = arith.minimumf %263, %262 : vector<1x12xf32>
      %cst_64 = arith.constant 0.000000e+00 : f32
      %265 = vector.broadcast %cst_64 : f32 to vector<1x12xf32>
      %266 = arith.subf %265, %198 : vector<1x12xf32>
      %267 = arith.mulf %244, %258 : vector<1x12xf32>
      %cst_65 = arith.constant 0.000000e+00 : f32
      %cst_66 = arith.constant 1.000000e+00 : f32
      %268 = vector.broadcast %cst_65 : f32 to vector<1x12xf32>
      %269 = arith.maximumf %268, %267 : vector<1x12xf32>
      %270 = vector.broadcast %cst_66 : f32 to vector<1x12xf32>
      %271 = arith.minimumf %270, %269 : vector<1x12xf32>
      %272 = arith.mulf %264, %271 : vector<1x12xf32>
      %273 = arith.addf %266, %272 : vector<1x12xf32>
      %274 = arith.mulf %273, %6 : vector<1x12xf32>
      %275 = arith.addf %198, %274 : vector<1x12xf32>
      %276 = arith.subf %203, %4 : vector<1x12xf32>
      %277 = arith.mulf %7, %276 : vector<1x12xf32>
      %278 = arith.addf %4, %277 : vector<1x12xf32>
      %279 = arith.subf %278, %14 : vector<1x12xf32>
      %280 = arith.select %247, %279, %245 : vector<1x12xi1>, vector<1x12xf32>
      %281 = arith.mulf %10, %206 : vector<1x12xf32>
      %282 = arith.select %247, %9, %55 : vector<1x12xi1>, vector<1x12xf32>
      %283 = arith.addf %281, %282 : vector<1x12xf32>
      %284 = arith.subf %280, %4 : vector<1x12xf32>
      %285 = arith.mulf %11, %284 : vector<1x12xf32>
      %286 = arith.subf %213, %13 : vector<1x12xf32>
      %287 = arith.mulf %12, %286 : vector<1x12xf32>
      %288 = arith.subf %285, %287 : vector<1x12xf32>
      %289 = arith.addf %213, %288 : vector<1x12xf32>
      %290 = arith.select %247, %213, %289 : vector<1x12xi1>, vector<1x12xf32>
      %291 = arith.mulf %15, %216 : vector<1x12xf32>
      %292 = arith.select %247, %8, %55 : vector<1x12xi1>, vector<1x12xf32>
      %293 = arith.addf %291, %292 : vector<1x12xf32>
      %294 = arith.addf %283, %290 : vector<1x12xf32>
      %295 = arith.subf %245, %294 : vector<1x12xf32>
      %296 = arith.negf %295 : vector<1x12xf32>
      %297 = math.exp %296 : vector<1x12xf32>
      %cst_67 = arith.constant 1.000000e+00 : f32
      %298 = vector.broadcast %cst_67 : f32 to vector<1x12xf32>
      %299 = arith.addf %298, %297 : vector<1x12xf32>
      %300 = arith.divf %298, %299 : vector<1x12xf32>
      %301 = vector.broadcast %34 : vector<8x1xf32> to vector<8x12xf32>
      %302 = vector.broadcast %300 : vector<1x12xf32> to vector<8x12xf32>
      %303 = arith.mulf %301, %302 : vector<8x12xf32>
      %304 = arith.addf %227, %303 : vector<8x12xf32>
      %305 = vector.extract_strided_slice %72 {offsets = [3, 0], sizes = [1, 12], strides = [1, 1]} : vector<8x12xf32> to vector<1x12xf32>
      %306 = arith.addf %293, %275 : vector<1x12xf32>
      %cst_68 = arith.constant 5.000000e-01 : f32
      %307 = vector.broadcast %cst_68 : f32 to vector<1x12xf32>
      %308 = arith.mulf %306, %307 : vector<1x12xf32>
      %309 = vector.broadcast %308 : vector<1x12xf32> to vector<12x12xf32>
      %310 = arith.mulf %309, %21 : vector<12x12xf32>
      %cst_69 = arith.constant dense<0.000000e+00> : vector<12xf32>
      %311 = vector.multi_reduction <add>, %310, %cst_69 [1] : vector<12x12xf32> to vector<12xf32>
      %312 = vector.shape_cast %311 : vector<12xf32> to vector<12x1xf32>
      %313 = vector.broadcast %312 : vector<12x1xf32> to vector<12x12xf32>
      %314 = arith.mulf %313, %16 : vector<12x12xf32>
      %cst_70 = arith.constant dense<0.000000e+00> : vector<12xf32>
      %315 = vector.multi_reduction <add>, %314, %cst_70 [0] : vector<12x12xf32> to vector<12xf32>
      %316 = vector.shape_cast %315 : vector<12xf32> to vector<1x12xf32>
      %317 = arith.subf %4, %280 : vector<1x12xf32>
      %318 = arith.mulf %3, %317 : vector<1x12xf32>
      %319 = arith.addf %316, %305 : vector<1x12xf32>
      %320 = arith.mulf %319, %5 : vector<1x12xf32>
      %321 = arith.addf %318, %320 : vector<1x12xf32>
      %322 = arith.addf %280, %321 : vector<1x12xf32>
      %323 = arith.addf %283, %290 : vector<1x12xf32>
      %324 = arith.cmpf oge, %322, %323 : vector<1x12xf32>
      %325 = tpu.reciprocal %323 {approx = true} : vector<1x12xf32> -> vector<1x12xf32>
      %326 = arith.mulf %323, %325 : vector<1x12xf32>
      %cst_71 = arith.constant 2.000000e+00 : f32
      %327 = vector.broadcast %cst_71 : f32 to vector<1x12xf32>
      %328 = arith.subf %327, %326 : vector<1x12xf32>
      %329 = arith.mulf %325, %328 : vector<1x12xf32>
      %330 = arith.subf %323, %4 : vector<1x12xf32>
      %331 = tpu.reciprocal %330 {approx = true} : vector<1x12xf32> -> vector<1x12xf32>
      %332 = arith.mulf %330, %331 : vector<1x12xf32>
      %cst_72 = arith.constant 2.000000e+00 : f32
      %333 = vector.broadcast %cst_72 : f32 to vector<1x12xf32>
      %334 = arith.subf %333, %332 : vector<1x12xf32>
      %335 = arith.mulf %331, %334 : vector<1x12xf32>
      %336 = arith.subf %322, %13 : vector<1x12xf32>
      %337 = arith.mulf %336, %329 : vector<1x12xf32>
      %cst_73 = arith.constant 0.000000e+00 : f32
      %cst_74 = arith.constant 1.000000e+00 : f32
      %338 = vector.broadcast %cst_73 : f32 to vector<1x12xf32>
      %339 = arith.maximumf %338, %337 : vector<1x12xf32>
      %340 = vector.broadcast %cst_74 : f32 to vector<1x12xf32>
      %341 = arith.minimumf %340, %339 : vector<1x12xf32>
      %cst_75 = arith.constant 0.000000e+00 : f32
      %342 = vector.broadcast %cst_75 : f32 to vector<1x12xf32>
      %343 = arith.subf %342, %275 : vector<1x12xf32>
      %344 = arith.mulf %321, %335 : vector<1x12xf32>
      %cst_76 = arith.constant 0.000000e+00 : f32
      %cst_77 = arith.constant 1.000000e+00 : f32
      %345 = vector.broadcast %cst_76 : f32 to vector<1x12xf32>
      %346 = arith.maximumf %345, %344 : vector<1x12xf32>
      %347 = vector.broadcast %cst_77 : f32 to vector<1x12xf32>
      %348 = arith.minimumf %347, %346 : vector<1x12xf32>
      %349 = arith.mulf %341, %348 : vector<1x12xf32>
      %350 = arith.addf %343, %349 : vector<1x12xf32>
      %351 = arith.mulf %350, %6 : vector<1x12xf32>
      %352 = arith.addf %275, %351 : vector<1x12xf32>
      %353 = arith.subf %280, %4 : vector<1x12xf32>
      %354 = arith.mulf %7, %353 : vector<1x12xf32>
      %355 = arith.addf %4, %354 : vector<1x12xf32>
      %356 = arith.subf %355, %14 : vector<1x12xf32>
      %357 = arith.select %324, %356, %322 : vector<1x12xi1>, vector<1x12xf32>
      %358 = arith.mulf %10, %283 : vector<1x12xf32>
      %359 = arith.select %324, %9, %55 : vector<1x12xi1>, vector<1x12xf32>
      %360 = arith.addf %358, %359 : vector<1x12xf32>
      %361 = arith.subf %357, %4 : vector<1x12xf32>
      %362 = arith.mulf %11, %361 : vector<1x12xf32>
      %363 = arith.subf %290, %13 : vector<1x12xf32>
      %364 = arith.mulf %12, %363 : vector<1x12xf32>
      %365 = arith.subf %362, %364 : vector<1x12xf32>
      %366 = arith.addf %290, %365 : vector<1x12xf32>
      %367 = arith.select %324, %290, %366 : vector<1x12xi1>, vector<1x12xf32>
      %368 = arith.mulf %15, %293 : vector<1x12xf32>
      %369 = arith.select %324, %8, %55 : vector<1x12xi1>, vector<1x12xf32>
      %370 = arith.addf %368, %369 : vector<1x12xf32>
      %371 = arith.addf %360, %367 : vector<1x12xf32>
      %372 = arith.subf %322, %371 : vector<1x12xf32>
      %373 = arith.negf %372 : vector<1x12xf32>
      %374 = math.exp %373 : vector<1x12xf32>
      %cst_78 = arith.constant 1.000000e+00 : f32
      %375 = vector.broadcast %cst_78 : f32 to vector<1x12xf32>
      %376 = arith.addf %375, %374 : vector<1x12xf32>
      %377 = arith.divf %375, %376 : vector<1x12xf32>
      %378 = vector.broadcast %38 : vector<8x1xf32> to vector<8x12xf32>
      %379 = vector.broadcast %377 : vector<1x12xf32> to vector<8x12xf32>
      %380 = arith.mulf %378, %379 : vector<8x12xf32>
      %381 = arith.addf %304, %380 : vector<8x12xf32>
      %382 = vector.extract_strided_slice %72 {offsets = [4, 0], sizes = [1, 12], strides = [1, 1]} : vector<8x12xf32> to vector<1x12xf32>
      %383 = arith.addf %370, %352 : vector<1x12xf32>
      %cst_79 = arith.constant 5.000000e-01 : f32
      %384 = vector.broadcast %cst_79 : f32 to vector<1x12xf32>
      %385 = arith.mulf %383, %384 : vector<1x12xf32>
      %386 = vector.broadcast %385 : vector<1x12xf32> to vector<12x12xf32>
      %387 = arith.mulf %386, %21 : vector<12x12xf32>
      %cst_80 = arith.constant dense<0.000000e+00> : vector<12xf32>
      %388 = vector.multi_reduction <add>, %387, %cst_80 [1] : vector<12x12xf32> to vector<12xf32>
      %389 = vector.shape_cast %388 : vector<12xf32> to vector<12x1xf32>
      %390 = vector.broadcast %389 : vector<12x1xf32> to vector<12x12xf32>
      %391 = arith.mulf %390, %16 : vector<12x12xf32>
      %cst_81 = arith.constant dense<0.000000e+00> : vector<12xf32>
      %392 = vector.multi_reduction <add>, %391, %cst_81 [0] : vector<12x12xf32> to vector<12xf32>
      %393 = vector.shape_cast %392 : vector<12xf32> to vector<1x12xf32>
      %394 = arith.subf %4, %357 : vector<1x12xf32>
      %395 = arith.mulf %3, %394 : vector<1x12xf32>
      %396 = arith.addf %393, %382 : vector<1x12xf32>
      %397 = arith.mulf %396, %5 : vector<1x12xf32>
      %398 = arith.addf %395, %397 : vector<1x12xf32>
      %399 = arith.addf %357, %398 : vector<1x12xf32>
      %400 = arith.addf %360, %367 : vector<1x12xf32>
      %401 = arith.cmpf oge, %399, %400 : vector<1x12xf32>
      %402 = tpu.reciprocal %400 {approx = true} : vector<1x12xf32> -> vector<1x12xf32>
      %403 = arith.mulf %400, %402 : vector<1x12xf32>
      %cst_82 = arith.constant 2.000000e+00 : f32
      %404 = vector.broadcast %cst_82 : f32 to vector<1x12xf32>
      %405 = arith.subf %404, %403 : vector<1x12xf32>
      %406 = arith.mulf %402, %405 : vector<1x12xf32>
      %407 = arith.subf %400, %4 : vector<1x12xf32>
      %408 = tpu.reciprocal %407 {approx = true} : vector<1x12xf32> -> vector<1x12xf32>
      %409 = arith.mulf %407, %408 : vector<1x12xf32>
      %cst_83 = arith.constant 2.000000e+00 : f32
      %410 = vector.broadcast %cst_83 : f32 to vector<1x12xf32>
      %411 = arith.subf %410, %409 : vector<1x12xf32>
      %412 = arith.mulf %408, %411 : vector<1x12xf32>
      %413 = arith.subf %399, %13 : vector<1x12xf32>
      %414 = arith.mulf %413, %406 : vector<1x12xf32>
      %cst_84 = arith.constant 0.000000e+00 : f32
      %cst_85 = arith.constant 1.000000e+00 : f32
      %415 = vector.broadcast %cst_84 : f32 to vector<1x12xf32>
      %416 = arith.maximumf %415, %414 : vector<1x12xf32>
      %417 = vector.broadcast %cst_85 : f32 to vector<1x12xf32>
      %418 = arith.minimumf %417, %416 : vector<1x12xf32>
      %cst_86 = arith.constant 0.000000e+00 : f32
      %419 = vector.broadcast %cst_86 : f32 to vector<1x12xf32>
      %420 = arith.subf %419, %352 : vector<1x12xf32>
      %421 = arith.mulf %398, %412 : vector<1x12xf32>
      %cst_87 = arith.constant 0.000000e+00 : f32
      %cst_88 = arith.constant 1.000000e+00 : f32
      %422 = vector.broadcast %cst_87 : f32 to vector<1x12xf32>
      %423 = arith.maximumf %422, %421 : vector<1x12xf32>
      %424 = vector.broadcast %cst_88 : f32 to vector<1x12xf32>
      %425 = arith.minimumf %424, %423 : vector<1x12xf32>
      %426 = arith.mulf %418, %425 : vector<1x12xf32>
      %427 = arith.addf %420, %426 : vector<1x12xf32>
      %428 = arith.mulf %427, %6 : vector<1x12xf32>
      %429 = arith.addf %352, %428 : vector<1x12xf32>
      %430 = arith.subf %357, %4 : vector<1x12xf32>
      %431 = arith.mulf %7, %430 : vector<1x12xf32>
      %432 = arith.addf %4, %431 : vector<1x12xf32>
      %433 = arith.subf %432, %14 : vector<1x12xf32>
      %434 = arith.select %401, %433, %399 : vector<1x12xi1>, vector<1x12xf32>
      %435 = arith.mulf %10, %360 : vector<1x12xf32>
      %436 = arith.select %401, %9, %55 : vector<1x12xi1>, vector<1x12xf32>
      %437 = arith.addf %435, %436 : vector<1x12xf32>
      %438 = arith.subf %434, %4 : vector<1x12xf32>
      %439 = arith.mulf %11, %438 : vector<1x12xf32>
      %440 = arith.subf %367, %13 : vector<1x12xf32>
      %441 = arith.mulf %12, %440 : vector<1x12xf32>
      %442 = arith.subf %439, %441 : vector<1x12xf32>
      %443 = arith.addf %367, %442 : vector<1x12xf32>
      %444 = arith.select %401, %367, %443 : vector<1x12xi1>, vector<1x12xf32>
      %445 = arith.mulf %15, %370 : vector<1x12xf32>
      %446 = arith.select %401, %8, %55 : vector<1x12xi1>, vector<1x12xf32>
      %447 = arith.addf %445, %446 : vector<1x12xf32>
      %448 = arith.addf %437, %444 : vector<1x12xf32>
      %449 = arith.subf %399, %448 : vector<1x12xf32>
      %450 = arith.negf %449 : vector<1x12xf32>
      %451 = math.exp %450 : vector<1x12xf32>
      %cst_89 = arith.constant 1.000000e+00 : f32
      %452 = vector.broadcast %cst_89 : f32 to vector<1x12xf32>
      %453 = arith.addf %452, %451 : vector<1x12xf32>
      %454 = arith.divf %452, %453 : vector<1x12xf32>
      %455 = vector.broadcast %42 : vector<8x1xf32> to vector<8x12xf32>
      %456 = vector.broadcast %454 : vector<1x12xf32> to vector<8x12xf32>
      %457 = arith.mulf %455, %456 : vector<8x12xf32>
      %458 = arith.addf %381, %457 : vector<8x12xf32>
      %459 = vector.extract_strided_slice %72 {offsets = [5, 0], sizes = [1, 12], strides = [1, 1]} : vector<8x12xf32> to vector<1x12xf32>
      %460 = arith.addf %447, %429 : vector<1x12xf32>
      %cst_90 = arith.constant 5.000000e-01 : f32
      %461 = vector.broadcast %cst_90 : f32 to vector<1x12xf32>
      %462 = arith.mulf %460, %461 : vector<1x12xf32>
      %463 = vector.broadcast %462 : vector<1x12xf32> to vector<12x12xf32>
      %464 = arith.mulf %463, %21 : vector<12x12xf32>
      %cst_91 = arith.constant dense<0.000000e+00> : vector<12xf32>
      %465 = vector.multi_reduction <add>, %464, %cst_91 [1] : vector<12x12xf32> to vector<12xf32>
      %466 = vector.shape_cast %465 : vector<12xf32> to vector<12x1xf32>
      %467 = vector.broadcast %466 : vector<12x1xf32> to vector<12x12xf32>
      %468 = arith.mulf %467, %16 : vector<12x12xf32>
      %cst_92 = arith.constant dense<0.000000e+00> : vector<12xf32>
      %469 = vector.multi_reduction <add>, %468, %cst_92 [0] : vector<12x12xf32> to vector<12xf32>
      %470 = vector.shape_cast %469 : vector<12xf32> to vector<1x12xf32>
      %471 = arith.subf %4, %434 : vector<1x12xf32>
      %472 = arith.mulf %3, %471 : vector<1x12xf32>
      %473 = arith.addf %470, %459 : vector<1x12xf32>
      %474 = arith.mulf %473, %5 : vector<1x12xf32>
      %475 = arith.addf %472, %474 : vector<1x12xf32>
      %476 = arith.addf %434, %475 : vector<1x12xf32>
      %477 = arith.addf %437, %444 : vector<1x12xf32>
      %478 = arith.cmpf oge, %476, %477 : vector<1x12xf32>
      %479 = tpu.reciprocal %477 {approx = true} : vector<1x12xf32> -> vector<1x12xf32>
      %480 = arith.mulf %477, %479 : vector<1x12xf32>
      %cst_93 = arith.constant 2.000000e+00 : f32
      %481 = vector.broadcast %cst_93 : f32 to vector<1x12xf32>
      %482 = arith.subf %481, %480 : vector<1x12xf32>
      %483 = arith.mulf %479, %482 : vector<1x12xf32>
      %484 = arith.subf %477, %4 : vector<1x12xf32>
      %485 = tpu.reciprocal %484 {approx = true} : vector<1x12xf32> -> vector<1x12xf32>
      %486 = arith.mulf %484, %485 : vector<1x12xf32>
      %cst_94 = arith.constant 2.000000e+00 : f32
      %487 = vector.broadcast %cst_94 : f32 to vector<1x12xf32>
      %488 = arith.subf %487, %486 : vector<1x12xf32>
      %489 = arith.mulf %485, %488 : vector<1x12xf32>
      %490 = arith.subf %476, %13 : vector<1x12xf32>
      %491 = arith.mulf %490, %483 : vector<1x12xf32>
      %cst_95 = arith.constant 0.000000e+00 : f32
      %cst_96 = arith.constant 1.000000e+00 : f32
      %492 = vector.broadcast %cst_95 : f32 to vector<1x12xf32>
      %493 = arith.maximumf %492, %491 : vector<1x12xf32>
      %494 = vector.broadcast %cst_96 : f32 to vector<1x12xf32>
      %495 = arith.minimumf %494, %493 : vector<1x12xf32>
      %cst_97 = arith.constant 0.000000e+00 : f32
      %496 = vector.broadcast %cst_97 : f32 to vector<1x12xf32>
      %497 = arith.subf %496, %429 : vector<1x12xf32>
      %498 = arith.mulf %475, %489 : vector<1x12xf32>
      %cst_98 = arith.constant 0.000000e+00 : f32
      %cst_99 = arith.constant 1.000000e+00 : f32
      %499 = vector.broadcast %cst_98 : f32 to vector<1x12xf32>
      %500 = arith.maximumf %499, %498 : vector<1x12xf32>
      %501 = vector.broadcast %cst_99 : f32 to vector<1x12xf32>
      %502 = arith.minimumf %501, %500 : vector<1x12xf32>
      %503 = arith.mulf %495, %502 : vector<1x12xf32>
      %504 = arith.addf %497, %503 : vector<1x12xf32>
      %505 = arith.mulf %504, %6 : vector<1x12xf32>
      %506 = arith.addf %429, %505 : vector<1x12xf32>
      %507 = arith.subf %434, %4 : vector<1x12xf32>
      %508 = arith.mulf %7, %507 : vector<1x12xf32>
      %509 = arith.addf %4, %508 : vector<1x12xf32>
      %510 = arith.subf %509, %14 : vector<1x12xf32>
      %511 = arith.select %478, %510, %476 : vector<1x12xi1>, vector<1x12xf32>
      %512 = arith.mulf %10, %437 : vector<1x12xf32>
      %513 = arith.select %478, %9, %55 : vector<1x12xi1>, vector<1x12xf32>
      %514 = arith.addf %512, %513 : vector<1x12xf32>
      %515 = arith.subf %511, %4 : vector<1x12xf32>
      %516 = arith.mulf %11, %515 : vector<1x12xf32>
      %517 = arith.subf %444, %13 : vector<1x12xf32>
      %518 = arith.mulf %12, %517 : vector<1x12xf32>
      %519 = arith.subf %516, %518 : vector<1x12xf32>
      %520 = arith.addf %444, %519 : vector<1x12xf32>
      %521 = arith.select %478, %444, %520 : vector<1x12xi1>, vector<1x12xf32>
      %522 = arith.mulf %15, %447 : vector<1x12xf32>
      %523 = arith.select %478, %8, %55 : vector<1x12xi1>, vector<1x12xf32>
      %524 = arith.addf %522, %523 : vector<1x12xf32>
      %525 = arith.addf %514, %521 : vector<1x12xf32>
      %526 = arith.subf %476, %525 : vector<1x12xf32>
      %527 = arith.negf %526 : vector<1x12xf32>
      %528 = math.exp %527 : vector<1x12xf32>
      %cst_100 = arith.constant 1.000000e+00 : f32
      %529 = vector.broadcast %cst_100 : f32 to vector<1x12xf32>
      %530 = arith.addf %529, %528 : vector<1x12xf32>
      %531 = arith.divf %529, %530 : vector<1x12xf32>
      %532 = vector.broadcast %46 : vector<8x1xf32> to vector<8x12xf32>
      %533 = vector.broadcast %531 : vector<1x12xf32> to vector<8x12xf32>
      %534 = arith.mulf %532, %533 : vector<8x12xf32>
      %535 = arith.addf %458, %534 : vector<8x12xf32>
      %536 = vector.extract_strided_slice %72 {offsets = [6, 0], sizes = [1, 12], strides = [1, 1]} : vector<8x12xf32> to vector<1x12xf32>
      %537 = arith.addf %524, %506 : vector<1x12xf32>
      %cst_101 = arith.constant 5.000000e-01 : f32
      %538 = vector.broadcast %cst_101 : f32 to vector<1x12xf32>
      %539 = arith.mulf %537, %538 : vector<1x12xf32>
      %540 = vector.broadcast %539 : vector<1x12xf32> to vector<12x12xf32>
      %541 = arith.mulf %540, %21 : vector<12x12xf32>
      %cst_102 = arith.constant dense<0.000000e+00> : vector<12xf32>
      %542 = vector.multi_reduction <add>, %541, %cst_102 [1] : vector<12x12xf32> to vector<12xf32>
      %543 = vector.shape_cast %542 : vector<12xf32> to vector<12x1xf32>
      %544 = vector.broadcast %543 : vector<12x1xf32> to vector<12x12xf32>
      %545 = arith.mulf %544, %16 : vector<12x12xf32>
      %cst_103 = arith.constant dense<0.000000e+00> : vector<12xf32>
      %546 = vector.multi_reduction <add>, %545, %cst_103 [0] : vector<12x12xf32> to vector<12xf32>
      %547 = vector.shape_cast %546 : vector<12xf32> to vector<1x12xf32>
      %548 = arith.subf %4, %511 : vector<1x12xf32>
      %549 = arith.mulf %3, %548 : vector<1x12xf32>
      %550 = arith.addf %547, %536 : vector<1x12xf32>
      %551 = arith.mulf %550, %5 : vector<1x12xf32>
      %552 = arith.addf %549, %551 : vector<1x12xf32>
      %553 = arith.addf %511, %552 : vector<1x12xf32>
      %554 = arith.addf %514, %521 : vector<1x12xf32>
      %555 = arith.cmpf oge, %553, %554 : vector<1x12xf32>
      %556 = tpu.reciprocal %554 {approx = true} : vector<1x12xf32> -> vector<1x12xf32>
      %557 = arith.mulf %554, %556 : vector<1x12xf32>
      %cst_104 = arith.constant 2.000000e+00 : f32
      %558 = vector.broadcast %cst_104 : f32 to vector<1x12xf32>
      %559 = arith.subf %558, %557 : vector<1x12xf32>
      %560 = arith.mulf %556, %559 : vector<1x12xf32>
      %561 = arith.subf %554, %4 : vector<1x12xf32>
      %562 = tpu.reciprocal %561 {approx = true} : vector<1x12xf32> -> vector<1x12xf32>
      %563 = arith.mulf %561, %562 : vector<1x12xf32>
      %cst_105 = arith.constant 2.000000e+00 : f32
      %564 = vector.broadcast %cst_105 : f32 to vector<1x12xf32>
      %565 = arith.subf %564, %563 : vector<1x12xf32>
      %566 = arith.mulf %562, %565 : vector<1x12xf32>
      %567 = arith.subf %553, %13 : vector<1x12xf32>
      %568 = arith.mulf %567, %560 : vector<1x12xf32>
      %cst_106 = arith.constant 0.000000e+00 : f32
      %cst_107 = arith.constant 1.000000e+00 : f32
      %569 = vector.broadcast %cst_106 : f32 to vector<1x12xf32>
      %570 = arith.maximumf %569, %568 : vector<1x12xf32>
      %571 = vector.broadcast %cst_107 : f32 to vector<1x12xf32>
      %572 = arith.minimumf %571, %570 : vector<1x12xf32>
      %cst_108 = arith.constant 0.000000e+00 : f32
      %573 = vector.broadcast %cst_108 : f32 to vector<1x12xf32>
      %574 = arith.subf %573, %506 : vector<1x12xf32>
      %575 = arith.mulf %552, %566 : vector<1x12xf32>
      %cst_109 = arith.constant 0.000000e+00 : f32
      %cst_110 = arith.constant 1.000000e+00 : f32
      %576 = vector.broadcast %cst_109 : f32 to vector<1x12xf32>
      %577 = arith.maximumf %576, %575 : vector<1x12xf32>
      %578 = vector.broadcast %cst_110 : f32 to vector<1x12xf32>
      %579 = arith.minimumf %578, %577 : vector<1x12xf32>
      %580 = arith.mulf %572, %579 : vector<1x12xf32>
      %581 = arith.addf %574, %580 : vector<1x12xf32>
      %582 = arith.mulf %581, %6 : vector<1x12xf32>
      %583 = arith.addf %506, %582 : vector<1x12xf32>
      %584 = arith.subf %511, %4 : vector<1x12xf32>
      %585 = arith.mulf %7, %584 : vector<1x12xf32>
      %586 = arith.addf %4, %585 : vector<1x12xf32>
      %587 = arith.subf %586, %14 : vector<1x12xf32>
      %588 = arith.select %555, %587, %553 : vector<1x12xi1>, vector<1x12xf32>
      %589 = arith.mulf %10, %514 : vector<1x12xf32>
      %590 = arith.select %555, %9, %55 : vector<1x12xi1>, vector<1x12xf32>
      %591 = arith.addf %589, %590 : vector<1x12xf32>
      %592 = arith.subf %588, %4 : vector<1x12xf32>
      %593 = arith.mulf %11, %592 : vector<1x12xf32>
      %594 = arith.subf %521, %13 : vector<1x12xf32>
      %595 = arith.mulf %12, %594 : vector<1x12xf32>
      %596 = arith.subf %593, %595 : vector<1x12xf32>
      %597 = arith.addf %521, %596 : vector<1x12xf32>
      %598 = arith.select %555, %521, %597 : vector<1x12xi1>, vector<1x12xf32>
      %599 = arith.mulf %15, %524 : vector<1x12xf32>
      %600 = arith.select %555, %8, %55 : vector<1x12xi1>, vector<1x12xf32>
      %601 = arith.addf %599, %600 : vector<1x12xf32>
      %602 = arith.addf %591, %598 : vector<1x12xf32>
      %603 = arith.subf %553, %602 : vector<1x12xf32>
      %604 = arith.negf %603 : vector<1x12xf32>
      %605 = math.exp %604 : vector<1x12xf32>
      %cst_111 = arith.constant 1.000000e+00 : f32
      %606 = vector.broadcast %cst_111 : f32 to vector<1x12xf32>
      %607 = arith.addf %606, %605 : vector<1x12xf32>
      %608 = arith.divf %606, %607 : vector<1x12xf32>
      %609 = vector.broadcast %50 : vector<8x1xf32> to vector<8x12xf32>
      %610 = vector.broadcast %608 : vector<1x12xf32> to vector<8x12xf32>
      %611 = arith.mulf %609, %610 : vector<8x12xf32>
      %612 = arith.addf %535, %611 : vector<8x12xf32>
      %613 = vector.extract_strided_slice %72 {offsets = [7, 0], sizes = [1, 12], strides = [1, 1]} : vector<8x12xf32> to vector<1x12xf32>
      %614 = arith.addf %601, %583 : vector<1x12xf32>
      %cst_112 = arith.constant 5.000000e-01 : f32
      %615 = vector.broadcast %cst_112 : f32 to vector<1x12xf32>
      %616 = arith.mulf %614, %615 : vector<1x12xf32>
      %617 = vector.broadcast %616 : vector<1x12xf32> to vector<12x12xf32>
      %618 = arith.mulf %617, %21 : vector<12x12xf32>
      %cst_113 = arith.constant dense<0.000000e+00> : vector<12xf32>
      %619 = vector.multi_reduction <add>, %618, %cst_113 [1] : vector<12x12xf32> to vector<12xf32>
      %620 = vector.shape_cast %619 : vector<12xf32> to vector<12x1xf32>
      %621 = vector.broadcast %620 : vector<12x1xf32> to vector<12x12xf32>
      %622 = arith.mulf %621, %16 : vector<12x12xf32>
      %cst_114 = arith.constant dense<0.000000e+00> : vector<12xf32>
      %623 = vector.multi_reduction <add>, %622, %cst_114 [0] : vector<12x12xf32> to vector<12xf32>
      %624 = vector.shape_cast %623 : vector<12xf32> to vector<1x12xf32>
      %625 = arith.subf %4, %588 : vector<1x12xf32>
      %626 = arith.mulf %3, %625 : vector<1x12xf32>
      %627 = arith.addf %624, %613 : vector<1x12xf32>
      %628 = arith.mulf %627, %5 : vector<1x12xf32>
      %629 = arith.addf %626, %628 : vector<1x12xf32>
      %630 = arith.addf %588, %629 : vector<1x12xf32>
      %631 = arith.addf %591, %598 : vector<1x12xf32>
      %632 = arith.cmpf oge, %630, %631 : vector<1x12xf32>
      %633 = tpu.reciprocal %631 {approx = true} : vector<1x12xf32> -> vector<1x12xf32>
      %634 = arith.mulf %631, %633 : vector<1x12xf32>
      %cst_115 = arith.constant 2.000000e+00 : f32
      %635 = vector.broadcast %cst_115 : f32 to vector<1x12xf32>
      %636 = arith.subf %635, %634 : vector<1x12xf32>
      %637 = arith.mulf %633, %636 : vector<1x12xf32>
      %638 = arith.subf %631, %4 : vector<1x12xf32>
      %639 = tpu.reciprocal %638 {approx = true} : vector<1x12xf32> -> vector<1x12xf32>
      %640 = arith.mulf %638, %639 : vector<1x12xf32>
      %cst_116 = arith.constant 2.000000e+00 : f32
      %641 = vector.broadcast %cst_116 : f32 to vector<1x12xf32>
      %642 = arith.subf %641, %640 : vector<1x12xf32>
      %643 = arith.mulf %639, %642 : vector<1x12xf32>
      %644 = arith.subf %630, %13 : vector<1x12xf32>
      %645 = arith.mulf %644, %637 : vector<1x12xf32>
      %cst_117 = arith.constant 0.000000e+00 : f32
      %cst_118 = arith.constant 1.000000e+00 : f32
      %646 = vector.broadcast %cst_117 : f32 to vector<1x12xf32>
      %647 = arith.maximumf %646, %645 : vector<1x12xf32>
      %648 = vector.broadcast %cst_118 : f32 to vector<1x12xf32>
      %649 = arith.minimumf %648, %647 : vector<1x12xf32>
      %cst_119 = arith.constant 0.000000e+00 : f32
      %650 = vector.broadcast %cst_119 : f32 to vector<1x12xf32>
      %651 = arith.subf %650, %583 : vector<1x12xf32>
      %652 = arith.mulf %629, %643 : vector<1x12xf32>
      %cst_120 = arith.constant 0.000000e+00 : f32
      %cst_121 = arith.constant 1.000000e+00 : f32
      %653 = vector.broadcast %cst_120 : f32 to vector<1x12xf32>
      %654 = arith.maximumf %653, %652 : vector<1x12xf32>
      %655 = vector.broadcast %cst_121 : f32 to vector<1x12xf32>
      %656 = arith.minimumf %655, %654 : vector<1x12xf32>
      %657 = arith.mulf %649, %656 : vector<1x12xf32>
      %658 = arith.addf %651, %657 : vector<1x12xf32>
      %659 = arith.mulf %658, %6 : vector<1x12xf32>
      %660 = arith.addf %583, %659 : vector<1x12xf32>
      %661 = arith.subf %588, %4 : vector<1x12xf32>
      %662 = arith.mulf %7, %661 : vector<1x12xf32>
      %663 = arith.addf %4, %662 : vector<1x12xf32>
      %664 = arith.subf %663, %14 : vector<1x12xf32>
      %665 = arith.select %632, %664, %630 : vector<1x12xi1>, vector<1x12xf32>
      %666 = arith.mulf %10, %591 : vector<1x12xf32>
      %667 = arith.select %632, %9, %55 : vector<1x12xi1>, vector<1x12xf32>
      %668 = arith.addf %666, %667 : vector<1x12xf32>
      %669 = arith.subf %665, %4 : vector<1x12xf32>
      %670 = arith.mulf %11, %669 : vector<1x12xf32>
      %671 = arith.subf %598, %13 : vector<1x12xf32>
      %672 = arith.mulf %12, %671 : vector<1x12xf32>
      %673 = arith.subf %670, %672 : vector<1x12xf32>
      %674 = arith.addf %598, %673 : vector<1x12xf32>
      %675 = arith.select %632, %598, %674 : vector<1x12xi1>, vector<1x12xf32>
      %676 = arith.mulf %15, %601 : vector<1x12xf32>
      %677 = arith.select %632, %8, %55 : vector<1x12xi1>, vector<1x12xf32>
      %678 = arith.addf %676, %677 : vector<1x12xf32>
      %679 = arith.addf %668, %675 : vector<1x12xf32>
      %680 = arith.subf %630, %679 : vector<1x12xf32>
      %681 = arith.negf %680 : vector<1x12xf32>
      %682 = math.exp %681 : vector<1x12xf32>
      %cst_122 = arith.constant 1.000000e+00 : f32
      %683 = vector.broadcast %cst_122 : f32 to vector<1x12xf32>
      %684 = arith.addf %683, %682 : vector<1x12xf32>
      %685 = arith.divf %683, %684 : vector<1x12xf32>
      %686 = vector.broadcast %54 : vector<8x1xf32> to vector<8x12xf32>
      %687 = vector.broadcast %685 : vector<1x12xf32> to vector<8x12xf32>
      %688 = arith.mulf %686, %687 : vector<8x12xf32>
      %689 = arith.addf %612, %688 : vector<8x12xf32>
      %690 = arith.index_cast %70 : i32 to index
      %c0_123 = arith.constant 0 : index
      %691 = vector.load %arg5[%690, %c0_123] : memref<64x12xf32, #tpu.memory_space<vmem>>, vector<8x12xf32>
      tpu.vector_store %arg5[%690, %c0_123], %689 {strides = array<i32>} : memref<64x12xf32, #tpu.memory_space<vmem>>, vector<8x12xf32>,
      scf.yield %665, %660, %668, %675, %678 : vector<1x12xf32>, vector<1x12xf32>, vector<1x12xf32>, vector<1x12xf32>, vector<1x12xf32>
    }
    %c8_i32_21 = arith.constant 8 : i32
    %c0_22 = arith.constant 0 : index
    %c0_23 = arith.constant 0 : index
    %64 = vector.load %arg6[%c0_22, %c0_23] : memref<5x12xf32, #tpu.memory_space<vmem>>, vector<1x12xf32>
    tpu.vector_store %arg6[%c0_22, %c0_23], %63#0 {strides = array<i32>} : memref<5x12xf32, #tpu.memory_space<vmem>>, vector<1x12xf32>,
    %c1_24 = arith.constant 1 : index
    %c0_25 = arith.constant 0 : index
    %65 = vector.load %arg6[%c1_24, %c0_25] : memref<5x12xf32, #tpu.memory_space<vmem>>, vector<1x12xf32>
    tpu.vector_store %arg6[%c1_24, %c0_25], %63#1 {strides = array<i32>} : memref<5x12xf32, #tpu.memory_space<vmem>>, vector<1x12xf32>,
    %c2_26 = arith.constant 2 : index
    %c0_27 = arith.constant 0 : index
    %66 = vector.load %arg6[%c2_26, %c0_27] : memref<5x12xf32, #tpu.memory_space<vmem>>, vector<1x12xf32>
    tpu.vector_store %arg6[%c2_26, %c0_27], %63#2 {strides = array<i32>} : memref<5x12xf32, #tpu.memory_space<vmem>>, vector<1x12xf32>,
    %c3_28 = arith.constant 3 : index
    %c0_29 = arith.constant 0 : index
    %67 = vector.load %arg6[%c3_28, %c0_29] : memref<5x12xf32, #tpu.memory_space<vmem>>, vector<1x12xf32>
    tpu.vector_store %arg6[%c3_28, %c0_29], %63#3 {strides = array<i32>} : memref<5x12xf32, #tpu.memory_space<vmem>>, vector<1x12xf32>,
    %c4_30 = arith.constant 4 : index
    %c0_31 = arith.constant 0 : index
    %68 = vector.load %arg6[%c4_30, %c0_31] : memref<5x12xf32, #tpu.memory_space<vmem>>, vector<1x12xf32>
    tpu.vector_store %arg6[%c4_30, %c0_31], %63#4 {strides = array<i32>} : memref<5x12xf32, #tpu.memory_space<vmem>>, vector<1x12xf32>,
    return
  }
  func.func @transform_0(%arg0: i32) -> (i32, i32) {
    %c0_i32 = arith.constant 0 : i32
    %c0_i32_0 = arith.constant 0 : i32
    return %arg0, %c0_i32 : i32, i32
  }
  func.func @transform_1(%arg0: i32) -> (i32, i32) {
    %c0_i32 = arith.constant 0 : i32
    %c0_i32_0 = arith.constant 0 : i32
    %c0_i32_1 = arith.constant 0 : i32
    return %c0_i32, %c0_i32_0 : i32, i32
  }
  func.func @transform_2(%arg0: i32) -> (i32, i32) {
    %c0_i32 = arith.constant 0 : i32
    %c0_i32_0 = arith.constant 0 : i32
    %c0_i32_1 = arith.constant 0 : i32
    return %c0_i32, %c0_i32_0 : i32, i32
  }
  func.func @transform_3(%arg0: i32) -> (i32, i32) {
    %c0_i32 = arith.constant 0 : i32
    %c0_i32_0 = arith.constant 0 : i32
    %c0_i32_1 = arith.constant 0 : i32
    return %c0_i32, %c0_i32_0 : i32, i32
  }
  func.func @transform_4(%arg0: i32) -> (i32, i32) {
    %c0_i32 = arith.constant 0 : i32
    %c0_i32_0 = arith.constant 0 : i32
    return %arg0, %c0_i32 : i32, i32
  }
  func.func @transform_5(%arg0: i32) -> (i32, i32) {
    %c0_i32 = arith.constant 0 : i32
    %c0_i32_0 = arith.constant 0 : i32
    %c0_i32_1 = arith.constant 0 : i32
    return %c0_i32, %c0_i32_0 : i32, i32
  }
}

</mosaic_0001>

<bundles_post_ra>
// kernel: glif_run.1
= control target key start
LH: loop header
LB: loop body
LE: loop exit
PB: predicated region body
PF: predicated region fallthrough
CT: control target
= control target key end

     0   :  { %11 = vsyncpa [#allocation3], 0  ;;  %vm25_vm0 = vcmask 94208   ;;  %v42_v5 = vlaneseq  ;;  %v1117_v21 = vmov 0.0   ;;  %s1881_s0 = inlined_call_operand.vmem [shape: f32[64,12], index: 0, kind: input, shape index: {}]   ;;  %s1882_s1 = inlined_call_operand.vmem [shape: f32[5,12], index: 1, kind: input, shape index: {}]   ;;  %s1883_s2 = inlined_call_operand.vmem [shape: f32[13,12], index: 2, kind: input, shape index: {}]   ;;  %s1884_s3 = inlined_call_operand.vmem [shape: f32[12,12], index: 3, kind: input, shape index: {}]   ;;  %s1885_s4 = inlined_call_operand.vmem [shape: f32[64,12], index: 4, kind: output, shape index: {0}]   ;;  %s1886_s5 = inlined_call_operand.hbm [shape: f32[5,12], index: 5, kind: output, shape index: {1}]  }
   0x1   :  { %v24_v0 = vld [vmem:[%s1882_s1] sm:$0x1f]  ;;  %v1185_v8 = vld [vmem:[%s1883_s2 + $0x5] sm:$0x1]  ;;  %v1190_v9 = vld [vmem:[%s1883_s2 + $0x6] sm:$0x1] }
   0x2   :  { %v1155_v1 = vld [vmem:[%s1884_s3] sm:$0xff]  ;;  %26 = vst.msk [vmem:[#allocation2] sm:$0x1f] %vm25_vm0, %v24_v0  ;;  %v1200_v11 = vld [vmem:[%s1883_s2 + $0x8] sm:$0x1]  ;;  %v1227_v17 = vshrl.u32 %v42_v5, 7 }
   0x3   :  { %v1160_v2 = vld [vmem:[%s1883_s2] sm:$0x1]  ;;  %v1165_v3 = vld [vmem:[%s1883_s2 + $0x1] sm:$0x1]  ;;  %v1170_v4 = vld [vmem:[%s1883_s2 + $0x2] sm:$0x1] }
   0x4   :  { %v1175_v6 = vld [vmem:[%s1883_s2 + $0x3] sm:$0x1]  ;;  %v1180_v7 = vld [vmem:[%s1883_s2 + $0x4] sm:$0x1]  ;;  %v1195_v10 = vld [vmem:[%s1883_s2 + $0x7] sm:$0x1] }
   0x5   :  { %v1205_v12 = vld [vmem:[%s1883_s2 + $0x9] sm:$0x1]  ;;  %v1210_v13 = vld [vmem:[%s1883_s2 + $0xa] sm:$0x1]  ;;  %v1215_v14 = vld [vmem:[%s1883_s2 + $0xb] sm:$0x1] }
   0x6   :  { %v1220_v15 = vld [vmem:[%s1883_s2 + $0xc] sm:$0x1]  ;;  %v1225_v16 = vld [vmem:[%s1884_s3 + $0x8] sm:$0xf]  ;;  %v46_v18 = vand.u32 127, %v42_v5  ;;  %v44_v19 = vadd.s32 8, %v1227_v17 }
   0x7   :  { %vm53_vm2 = vcmp.eq.s32.totalorder %v1227_v17, 0  ;;  %vm56_vm3 = vcmp.eq.s32.totalorder %v1227_v17, 1  ;;  %vm59_vm4 = vcmp.eq.s32.totalorder %v1227_v17, 2  ;;  %vm62_vm6 = vcmp.eq.s32.totalorder %v1227_v17, 3  ;;  %s1269_s2 = smov 0  }
   0x8   :  { %vm47_vm1 = vcmp.eq.s32.totalorder %v1227_v17, %v46_v18  ;;  %v1235_v23 = vsel %vm53_vm2, 1.0, %v1117_v21  ;;  %v1237_v24 = vsel %vm56_vm3, 1.0, %v1117_v21  ;;  %vm48_vm5 = vcmp.eq.s32.totalorder %v44_v19, %v46_v18 }
   0x9   :  { %v77_v20 = vld [vmem:[#allocation2] sm:$0x1f]   ;;  %v1233_v22 = vsel %vm47_vm1, 1.0, %v1117_v21  ;;  %v1240_v28 = vsel %vm48_vm5, 1.0, %v1117_v21  ;;  %v1242_v29 = vsel %vm59_vm4, 1.0, %v1117_v21  ;;  %vm65_vm7 = vcmp.eq.s32.totalorder %v1227_v17, 4 }
   0xa   :  { %v79_v25 = vrot.slane %v77_v20, 2   ;;  %v81_v26 = vrot.slane %v77_v20, 3   ;;  %v83_v27 = vrot.slane %v77_v20, 4   ;;  %v1246_v30 = vsel %vm62_vm6, 1.0, %v1117_v21 }
   0xb   :  { %v1248_v31 = vsel %vm65_vm7, 1.0, %v1117_v21  ;;  %vm68_vm8 = vcmp.eq.s32.totalorder %v1227_v17, 5  ;;  %vm71_vm9 = vcmp.eq.s32.totalorder %v1227_v17, 6  ;;  %vm74_vm10 = vcmp.eq.s32.totalorder %v1227_v17, 7 }
   0xc   :  { %v1252_v32 = vsel %vm68_vm8, 1.0, %v1117_v21  ;;  %v1254_v33 = vsel %vm71_vm9, 1.0, %v1117_v21  ;;  %v1257_v34 = vsel %vm74_vm10, 1.0, %v1117_v21  ;;  %v1887_v35 = vmov %v77_v20 }
   0xd LB: > { %v100_v36 = vrot.slane %v1107_v35, 1  ;;  %v1288_v38 = vsub.s32 0, %v1227_v17  ;;  %vm110_vm11 = vcmask 97280   ;;  %vm114_vm12 = vcmask 93184   ;;  %s923_s3 = sshll.u32 %s1115_s2, 3  ;;  %s90_s2 = sadd.s32 1, %s1115_s2   ;;  %s1115_s2 = sphi %s1269_s2, %s90_s2   ;;  %v1111_v20 = vphi %v77_v20, %v1892_v20   ;;  %v1107_v35 = vphi %v1887_v35, %v1891_v35   ;;  %v1103_v25 = vphi %v79_v25, %v1890_v25   ;;  %v1099_v26 = vphi %v81_v26, %v1889_v26   ;;  %v1095_v27 = vphi %v83_v27, %v1888_v27  }
   0xe   : > { %v1296_v45 = vadd.f32 %v1099_v26, %v1103_v25  ;;  %v164_v58 = vsub.f32 %v1111_v20, %v1165_v3  ;;  %s1312_s26 = scalar_lea.vmem %s1881_s0, %s923_s3  ;;  %v129_v62 = vsub.f32 %v1165_v3, %v1111_v20  ;;  %s862_s28 = scalar_lea.vmem %s1885_s4, %s923_s3 }
   0xf   : > { %v102_v37 = vadd.f32 %v1095_v27, %v100_v36  ;;  %v1316_v0 = vld [vmem:[%s1312_s26] sm:$0xff]  ;;  %p87_p0 = scmp.ge.s32.totalorder %s90_s2, 8  }
  0x10   : > { %v141_v46 = vsub.f32 %v1296_v45, %v1165_v3  ;;  %v165_v5 = vmul.f32 %v164_v58, %v1180_v7  ;;  %v130_v36 = vmul.f32 %v129_v62, %v1160_v2  ;;  %v150_v62 = vsub.f32 0.0, %v1107_v35  ;;  %s1118_s29 = smov (%p87_p0), [#allocation2]  }
  0x11   : > { %v103_v39 = vmul.f32 0.5, %v102_v37  ;;  %vm864_vm5 = vcmask (%p87_p0), 90112   ;;  %vm866_vm6 = vcmask (%p87_p0), 91137   ;;  %s879_s30 = sshll.u32 (%p87_p0), %s1118_s29, 4  ;;  %s880_s30 = int_to_ptr.vmem [resolvable:$true] %s879_s30 }
  0x12   : > { %982 = vrcp.f32 %v141_v46  ;;  %s1047_s6 = scalar_lea.vmem (%p87_p0), %s880_s30, 128  ;;  %p1052_p2 = scmp.lt.s32.totalorder (%p87_p0), %s880_s30, %s880_s30 }
  0x13   : > { %v107_v40 = vrot.slane %v103_v39, %v1288_v38  ;;  %984 = vrcp.f32 %v1296_v45  ;;  %v166_v39 = vadd.f32 %v165_v5, %v1165_v3  ;;  %p1048_p1 = scmp.ne.s32.totalorder (%p87_p0), %s880_s30, %s1047_s6  ;;  %p1053_p3 = scmp.lt.s32.totalorder (%p87_p0), %s1047_s6, %s1047_s6 }
  0x15   : > { %v108_v41 = vmul.f32 %v1233_v22, %v107_v40  ;;  %v109_v42 = vmul.f32 %v1240_v28, %v107_v40  ;;  %p1054_p4 = por (%p87_p0), %p1053_p3, %p1052_p2 }
  0x17   : > { %v111_v43 = vsel %vm110_vm11, %v108_v41, 0.0  ;;  %v115_v44 = vsel %vm114_vm12, %v109_v42, 0.0  ;;  %p1055_p5 = pnand (%p87_p0), %p1054_p4, %p1048_p1 }
  0x18   : > { %112 = vadd.xlane.f32.xlu0 %v111_v43 }
  0x1c   : > { %116 = vadd.xlane.f32.xlu0 %v115_v44  ;;  %v167_v44 = vsub.f32 %v166_v39, %v1215_v14 }
  0x1f   : > { %v983_v56 = vpop.eup %982 }
  0x20   : > { %v143_v59 = vmul.f32 %v983_v56, %v141_v46  ;;  %v985_v61 = vpop.eup %984 }
  0x21   : > { %v138_v18 = vmul.f32 %v985_v61, %v1296_v45 }
  0x22   : > { %v144_v19 = vsub.f32 2.0, %v143_v59 }
  0x23   : > { %v139_v40 = vsub.f32 2.0, %v138_v18 }
  0x24   : > { %v145_v41 = vmul.f32 %v983_v56, %v144_v19  ;;  %v1353_v19 = vrot.slane %v1175_v6, 7 }
  0x25   : > { %v140_v46 = vmul.f32 %v985_v61, %v139_v40 }
  0xa1   : > { %v113_v47 = vpop.xlane.xlu0 %112 }
  0xa2   : > { %v118_v48 = vmul.f32 %v113_v47, %v1155_v1 }
  0xa4   : > { %v120_v51 = vsel %vm110_vm11, %v118_v48, 0.0 }
  0xa5   : > { %v117_v49 = vpop.xlane.xlu0 %116 }
  0xa6   : > { %v119_v50 = vmul.f32 %v117_v49, %v1225_v16  ;;  %v169_v49 = vmul.f32 %v1103_v25, %v1195_v10 }
  0xa8   : > { %v121_v52 = vsel %vm114_vm12, %v119_v50, 0.0  ;;  %v174_v50 = vsub.f32 %v1099_v26, %v1210_v13 }
  0xa9   : > { %v122_v53 = vadd.f32 %v121_v52, %v120_v51 }
  0xab   : > { %v123_v54 = vrot.slane %v122_v53, 4 }
  0xad   : > { %v124_v55 = vadd.f32 %v123_v54, %v122_v53 }
  0xaf   : > { %v125_v57 = vrot.slane %v124_v55, 2 }
  0xb1   : > { %v126_v60 = vadd.f32 %v125_v57, %v124_v55  ;;  %v175_v55 = vmul.f32 %v174_v50, %v1205_v12 }
  0xb3   : > { %v127_v63 = vrot.slane %v126_v60, 1 }
  0xb5   : > { %v128_v21 = vadd.f32 %v127_v63, %v126_v60 }
  0xb7   : > { %v131_v37 = vadd.f32 %v128_v21, %v1316_v0 }
  0xb9   : > { %v132_v42 = vmul.f32 %v131_v37, %v1170_v4  ;;  %v179_v37 = vmul.f32 %v1095_v27, %v1220_v15 }
  0xbb   : > { %v133_v43 = vadd.f32 %v132_v42, %v130_v36 }
  0xbd   : > { %v1325_v47 = vadd.f32 %v1111_v20, %v133_v43  ;;  %v151_v48 = vmul.f32 %v145_v41, %v133_v43 }
  0xbf   : > { %v146_v51 = vsub.f32 %v1325_v47, %v1210_v13  ;;  %vm136_vm13 = vcmp.ge.f32.partialorder %v1325_v47, %v1296_v45  ;;  %v152_v53 = vmax.f32 %v151_v48, 0.0 }
  0xc0   : > { %v1338_v52 = vsel %vm136_vm13, %v167_v44, %v1325_v47  ;;  %v170_v20 = vsel %vm136_vm13, %v1190_v9, 0.0  ;;  %v180_v40 = vsel %vm136_vm13, %v1185_v8, 0.0 }
  0xc1   : > { %v147_v25 = vmul.f32 %v146_v51, %v140_v46  ;;  %v1344_v54 = vadd.f32 %v170_v20, %v169_v49  ;;  %v172_v56 = vsub.f32 %v1338_v52, %v1165_v3  ;;  %v153_v60 = vmin.f32 %v152_v53, 1.0 }
  0xc2   : > { %v181_v42 = vadd.f32 %v180_v40, %v179_v37  ;;  %v224_v40 = vsub.f32 %v1165_v3, %v1338_v52 }
  0xc3   : > { %v148_v57 = vmax.f32 %v147_v25, 0.0  ;;  %v173_v58 = vmul.f32 %v172_v56, %v1200_v11 }
  0xc5   : > { %v149_v59 = vmin.f32 %v148_v57, 1.0  ;;  %v176_v61 = vsub.f32 %v173_v58, %v175_v55 }
  0xc7   : > { %v154_v63 = vmul.f32 %v153_v60, %v149_v59  ;;  %v177_v5 = vadd.f32 %v1099_v26, %v176_v61 }
  0xc9   : > { %v156_v18 = vrot.slane %v154_v63, 7  ;;  %v1359_v21 = vsel %vm136_vm13, %v1099_v26, %v177_v5 }
  0xcb   : > { %v158_v36 = vadd.f32 %v156_v18, %v150_v62  ;;  %v228_v18 = vrot.slane %v1170_v4, 7 }
  0xcd   : > { %v162_v39 = vmul.f32 %v1353_v19, %v158_v36 }
  0xcf   : > { %v1369_v41 = vadd.f32 %v1107_v35, %v162_v39  ;;  %v1379_v35 = vadd.f32 %v1359_v21, %v1344_v54 }
  0xd1   : > { %v197_v43 = vrot.slane %v1369_v41, 1  ;;  %v241_v51 = vsub.f32 %v1379_v35, %v1165_v3 }
  0xd3   : > { %v199_v44 = vadd.f32 %v197_v43, %v181_v42  ;;  %986 = vrcp.f32 %v241_v51 }
  0xd4   : > { %988 = vrcp.f32 %v1379_v35 }
  0xd5   : > { %v200_v26 = vmul.f32 0.5, %v199_v44  ;;  %v261_v44 = vmul.f32 %v172_v56, %v1180_v7  ;;  %v265_v56 = vmul.f32 %v1344_v54, %v1195_v10 }
  0xd7   : > { %v204_v46 = vrot.slane %v200_v26, %v1288_v38 }
  0xd9   : > { %v205_v48 = vmul.f32 %v1233_v22, %v204_v46  ;;  %v206_v49 = vmul.f32 %v1240_v28, %v204_v46 }
  0xdb   : > { %v207_v27 = vsel %vm110_vm11, %v205_v48, 0.0  ;;  %v210_v45 = vsel %vm114_vm12, %v206_v49, 0.0 }
  0xdc   : > { %208 = vadd.xlane.f32.xlu1 %v207_v27  ;;  %v225_v27 = vmul.f32 %v224_v40, %v1160_v2 }
  0xe0   : > { %211 = vadd.xlane.f32.xlu1 %v210_v45  ;;  %v987_v63 = vpop.eup %986  ;;  %v262_v45 = vadd.f32 %v261_v44, %v1165_v3 }
  0xe1   : > { %v243_v37 = vmul.f32 %v987_v63, %v241_v51  ;;  %v989_v39 = vpop.eup %988 }
  0xe2   : > { %v238_v48 = vmul.f32 %v989_v39, %v1379_v35 }
  0xe3   : > { %v244_v46 = vsub.f32 2.0, %v243_v37 }
  0xe4   : > { %v239_v51 = vsub.f32 2.0, %v238_v48 }
 0x165   : > { %v209_v50 = vpop.xlane.xlu1 %208 }
 0x166   : > { %v213_v20 = vmul.f32 %v209_v50, %v1155_v1 }
 0x168   : > { %v215_v55 = vsel %vm110_vm11, %v213_v20, 0.0  ;;  %v245_v20 = vmul.f32 %v987_v63, %v244_v46 }
 0x169   : > { %v212_v25 = vpop.xlane.xlu1 %211 }
 0x16a   : > { %v214_v53 = vmul.f32 %v212_v25, %v1225_v16 }
 0x16c   : > { %v216_v57 = vsel %vm114_vm12, %v214_v53, 0.0 }
 0x16d   : > { %v217_v58 = vadd.f32 %v216_v57, %v215_v55  ;;  %v275_v55 = vmul.f32 %v181_v42, %v1220_v15  ;;  %v263_v57 = vsub.f32 %v262_v45, %v1215_v14 }
 0x16f   : > { %v218_v59 = vrot.slane %v217_v58, 4 }
 0x171   : > { %v219_v60 = vadd.f32 %v218_v59, %v217_v58  ;;  %v270_v58 = vsub.f32 %v1359_v21, %v1210_v13  ;;  %v240_v59 = vmul.f32 %v989_v39, %v239_v51 }
 0x173   : > { %v220_v61 = vrot.slane %v219_v60, 2  ;;  %v271_v37 = vmul.f32 %v270_v58, %v1205_v12 }
 0x175   : > { %v221_v62 = vadd.f32 %v220_v61, %v219_v60  ;;  %v183_v61 = vsub.f32 %v1325_v47, %v1379_v35 }
 0x177   : > { %v222_v5 = vrot.slane %v221_v62, 1  ;;  %v924_v40 = vmul.f32 -1.442695, %v183_v61 }
 0x179   : > { %v223_v36 = vadd.f32 %v222_v5, %v221_v62  ;;  %990 = vpow2.f32 %v924_v40 }
 0x17b   : > { %v226_v43 = vadd.f32 %v223_v36, %v1316_v0 }
 0x17d   : > { %v230_v26 = vmul.f32 %v228_v18, %v226_v43 }
 0x17f   : > { %v232_v49 = vrot.slane %v230_v26, 1 }
 0x181   : > { %v234_v50 = vadd.f32 %v232_v49, %v225_v27  ;;  %v250_v27 = vsub.f32 0.0, %v1369_v41 }
 0x183   : > { %v235_v25 = vadd.f32 %v234_v50, %v1338_v52  ;;  %v251_v53 = vmul.f32 %v245_v20, %v234_v50 }
 0x185   : > { %vm236_vm14 = vcmp.ge.f32.partialorder %v235_v25, %v1379_v35  ;;  %v246_v60 = vsub.f32 %v235_v25, %v1210_v13  ;;  %v252_v62 = vmax.f32 %v251_v53, 0.0 }
 0x186   : > { %v276_v52 = vsel %vm236_vm14, %v1185_v8, 0.0  ;;  %v1412_v54 = vsel %vm236_vm14, %v263_v57, %v235_v25  ;;  %v266_v42 = vsel %vm236_vm14, %v1190_v9, 0.0  ;;  %v991_v58 = vpop.eup %990 }
 0x187   : > { %v247_v63 = vmul.f32 %v246_v60, %v240_v59  ;;  %v1417_v5 = vadd.f32 %v276_v52, %v275_v55  ;;  %v1419_v18 = vadd.f32 %v266_v42, %v265_v56  ;;  %v1423_v47 = vsub.f32 %v1412_v54, %v1165_v3 }
 0x188   : > { %v253_v43 = vmin.f32 %v252_v62, 1.0  ;;  %v187_v60 = vadd.f32 1.0, %v991_v58 }
 0x189   : > { %v248_v36 = vmax.f32 %v247_v63, 0.0  ;;  %v269_v39 = vmul.f32 %v1423_v47, %v1200_v11 }
 0x18b   : > { %v249_v44 = vmin.f32 %v248_v36, 1.0  ;;  %v272_v26 = vsub.f32 %v269_v39, %v271_v37 }
 0x18d   : > { %v254_v46 = vmul.f32 %v253_v43, %v249_v44  ;;  %v273_v48 = vadd.f32 %v272_v26, %v1359_v21 }
 0x18f   : > { %v256_v49 = vrot.slane %v254_v46, 7  ;;  %v1433_v45 = vsel %vm236_vm14, %v1359_v21, %v273_v48 }
 0x190   : > { %v1437_v20 = vadd.f32 %v1433_v45, %v1419_v18 }
 0x191   : > { %v258_v50 = vadd.f32 %v256_v49, %v250_v27 }
 0x192   : > { %v279_v53 = vsub.f32 %v235_v25, %v1437_v20  ;;  %v336_v26 = vsub.f32 %v1437_v20, %v1165_v3 }
 0x193   : > { %v259_v51 = vmul.f32 %v258_v50, %v1353_v19 }
 0x194   : > { %v925_v56 = vmul.f32 -1.442695, %v279_v53 }
 0x195   : > { %v1442_v55 = vadd.f32 %v259_v51, %v1369_v41 }
 0x196   : > { %992 = vpow2.f32 %v925_v56 }
 0x197   : > { %v293_v57 = vrot.slane %v1442_v55, 1  ;;  %994 = vrcp.f32 %v187_v60  ;;  %v323_v60 = vrot.slane %v1170_v4, 6 }
 0x199   : > { %v295_v35 = vadd.f32 %v293_v57, %v1417_v5 }
 0x19b   : > { %v296_v21 = vmul.f32 0.5, %v295_v35 }
 0x19d   : > { %v300_v59 = vrot.slane %v296_v21, %v1288_v38 }
 0x19f   : > { %v302_v61 = vmul.f32 %v1240_v28, %v300_v59  ;;  %v301_v52 = vmul.f32 %v1233_v22, %v300_v59 }
 0x1a1   : > { %v306_v25 = vsel %vm114_vm12, %v302_v61, 0.0  ;;  %v303_v41 = vsel %vm110_vm11, %v301_v52, 0.0 }
 0x1a2   : > { %307 = vadd.xlane.f32.xlu1 %v306_v25  ;;  %304 = vadd.xlane.f32.xlu0 %v303_v41  ;;  %v320_v41 = vsub.f32 %v1165_v3, %v1412_v54 }
 0x1a3   : > { %v993_v42 = vpop.eup %992 }
 0x1a4   : > { %v283_v62 = vadd.f32 1.0, %v993_v42  ;;  %v995_v63 = vpop.eup %994 }
 0x1a5   : > { %v193_v36 = vrot.slane %v995_v63, %v1288_v38 }
 0x1a6   : > { %996 = vrcp.f32 %v283_v62  ;;  %v356_v62 = vmul.f32 %v1423_v47, %v1180_v7  ;;  %v360_v47 = vmul.f32 %v1419_v18, %v1195_v10 }
 0x1a7   : > { %v194_v40 = vmul.f32 %v1235_v23, %v193_v36  ;;  %998 = vrcp.f32 %v336_v26 }
 0x1a8   : > { %1000 = vrcp.f32 %v1437_v20 }
 0x1b3   : > { %v997_v37 = vpop.eup %996 }
 0x1b4   : > { %v289_v39 = vrot.slane %v997_v37, %v1288_v38  ;;  %v999_v58 = vpop.eup %998 }
 0x1b5   : > { %v338_v52 = vmul.f32 %v999_v58, %v336_v26  ;;  %v1001_v25 = vpop.eup %1000 }
 0x1b6   : > { %v290_v43 = vmul.f32 %v1237_v24, %v289_v39  ;;  %v333_v37 = vmul.f32 %v1001_v25, %v1437_v20  ;;  %v321_v39 = vmul.f32 %v320_v41, %v1160_v2 }
 0x1b7   : > { %v339_v36 = vsub.f32 2.0, %v338_v52 }
 0x1b8   : > { %v1455_v44 = vadd.f32 %v290_v43, %v194_v40  ;;  %v357_v43 = vadd.f32 %v356_v62, %v1165_v3 }
 0x1b9   : > { %v340_v26 = vmul.f32 %v999_v58, %v339_v36 }
 0x22b   : > { %v308_v46 = vpop.xlane.xlu1 %307  ;;  %v305_v48 = vpop.xlane.xlu0 %304 }
 0x22c   : > { %v310_v27 = vmul.f32 %v308_v46, %v1225_v16  ;;  %v309_v49 = vmul.f32 %v305_v48, %v1155_v1  ;;  %v334_v48 = vsub.f32 2.0, %v333_v37  ;;  %v345_v37 = vsub.f32 0.0, %v1442_v55 }
 0x22e   : > { %v312_v50 = vsel %vm114_vm12, %v310_v27, 0.0  ;;  %v311_v51 = vsel %vm110_vm11, %v309_v49, 0.0 }
 0x22f   : > { %v313_v53 = vadd.f32 %v312_v50, %v311_v51  ;;  %v358_v50 = vsub.f32 %v357_v43, %v1215_v14  ;;  %v335_v51 = vmul.f32 %v1001_v25, %v334_v48 }
 0x231   : > { %v314_v56 = vrot.slane %v313_v53, 4 }
 0x233   : > { %v315_v57 = vadd.f32 %v314_v56, %v313_v53  ;;  %v370_v56 = vmul.f32 %v1417_v5, %v1220_v15 }
 0x235   : > { %v316_v35 = vrot.slane %v315_v57, 2 }
 0x237   : > { %v317_v21 = vadd.f32 %v316_v35, %v315_v57  ;;  %v365_v57 = vsub.f32 %v1433_v45, %v1210_v13 }
 0x239   : > { %v318_v59 = vrot.slane %v317_v21, 1  ;;  %v366_v52 = vmul.f32 %v365_v57, %v1205_v12 }
 0x23b   : > { %v319_v61 = vadd.f32 %v318_v59, %v317_v21 }
 0x23d   : > { %v322_v42 = vadd.f32 %v319_v61, %v1316_v0 }
 0x23f   : > { %v325_v63 = vmul.f32 %v323_v60, %v322_v42 }
 0x241   : > { %v327_v40 = vrot.slane %v325_v63, 2 }
 0x243   : > { %v329_v46 = vadd.f32 %v327_v40, %v321_v39 }
 0x245   : > { %v330_v27 = vadd.f32 %v329_v46, %v1412_v54  ;;  %v346_v49 = vmul.f32 %v340_v26, %v329_v46 }
 0x247   : > { %vm331_vm15 = vcmp.ge.f32.partialorder %v330_v27, %v1437_v20  ;;  %v341_v53 = vsub.f32 %v330_v27, %v1210_v13  ;;  %v347_v21 = vmax.f32 %v346_v49, 0.0 }
 0x248   : > { %v371_v54 = vsel %vm331_vm15, %v1185_v8, 0.0  ;;  %v1488_v35 = vsel %vm331_vm15, %v358_v50, %v330_v27  ;;  %v361_v18 = vsel %vm331_vm15, %v1190_v9, 0.0 }
 0x249   : > { %v342_v58 = vmul.f32 %v341_v53, %v335_v51  ;;  %v1493_v59 = vadd.f32 %v371_v54, %v370_v56  ;;  %v1495_v5 = vadd.f32 %v361_v18, %v360_v47  ;;  %v363_v60 = vsub.f32 %v1488_v35, %v1165_v3 }
 0x24a   : > { %v348_v41 = vmin.f32 %v347_v21, 1.0 }
 0x24b   : > { %v343_v61 = vmax.f32 %v342_v58, 0.0  ;;  %v364_v25 = vmul.f32 %v363_v60, %v1200_v11 }
 0x24d   : > { %v344_v42 = vmin.f32 %v343_v61, 1.0  ;;  %v367_v62 = vsub.f32 %v364_v25, %v366_v52 }
 0x24f   : > { %v349_v63 = vmul.f32 %v348_v41, %v344_v42  ;;  %v368_v36 = vadd.f32 %v367_v62, %v1433_v45 }
 0x251   : > { %v351_v39 = vrot.slane %v349_v63, 7  ;;  %v1506_v40 = vsel %vm331_vm15, %v1433_v45, %v368_v36 }
 0x252   : > { %v1510_v46 = vadd.f32 %v1506_v40, %v1495_v5 }
 0x253   : > { %v353_v43 = vadd.f32 %v351_v39, %v345_v37 }
 0x254   : > { %v374_v48 = vsub.f32 %v330_v27, %v1510_v46  ;;  %v431_v52 = vsub.f32 %v1510_v46, %v1165_v3 }
 0x255   : > { %v354_v26 = vmul.f32 %v353_v43, %v1353_v19 }
 0x256   : > { %v926_v50 = vmul.f32 -1.442695, %v374_v48 }
 0x257   : > { %v1515_v49 = vadd.f32 %v354_v26, %v1442_v55 }
 0x258   : > { %1002 = vpow2.f32 %v926_v50 }
 0x259   : > { %v388_v47 = vrot.slane %v1515_v49, 1 }
 0x25b   : > { %v390_v20 = vadd.f32 %v388_v47, %v1493_v59  ;;  %v418_v47 = vrot.slane %v1170_v4, 5 }
 0x25d   : > { %v391_v45 = vmul.f32 0.5, %v390_v20 }
 0x25f   : > { %v395_v51 = vrot.slane %v391_v45, %v1288_v38 }
 0x261   : > { %v397_v53 = vmul.f32 %v1240_v28, %v395_v51  ;;  %v396_v56 = vmul.f32 %v1233_v22, %v395_v51 }
 0x263   : > { %v401_v57 = vsel %vm114_vm12, %v397_v53, 0.0  ;;  %v398_v27 = vsel %vm110_vm11, %v396_v56, 0.0  ;;  %v415_v53 = vsub.f32 %v1165_v3, %v1488_v35 }
 0x264   : > { %402 = vadd.xlane.f32.xlu1 %v401_v57  ;;  %399 = vadd.xlane.f32.xlu0 %v398_v27  ;;  %v451_v57 = vmul.f32 %v363_v60, %v1180_v7  ;;  %v455_v60 = vmul.f32 %v1495_v5, %v1195_v10 }
 0x265   : > { %v1003_v55 = vpop.eup %1002 }
 0x266   : > { %v378_v54 = vadd.f32 1.0, %v1003_v55 }
 0x268   : > { %1004 = vrcp.f32 %v378_v54 }
 0x269   : > { %1006 = vrcp.f32 %v431_v52 }
 0x26a   : > { %1008 = vrcp.f32 %v1510_v46 }
 0x275   : > { %v1005_v18 = vpop.eup %1004 }
 0x276   : > { %v384_v21 = vrot.slane %v1005_v18, %v1288_v38  ;;  %v1007_v48 = vpop.eup %1006  ;;  %v416_v18 = vmul.f32 %v415_v53, %v1160_v2 }
 0x277   : > { %v433_v45 = vmul.f32 %v1007_v48, %v431_v52  ;;  %v1009_v51 = vpop.eup %1008 }
 0x278   : > { %v385_v58 = vmul.f32 %v1242_v29, %v384_v21  ;;  %v428_v54 = vmul.f32 %v1009_v51, %v1510_v46 }
 0x279   : > { %v434_v55 = vsub.f32 2.0, %v433_v45 }
 0x27a   : > { %v1527_v61 = vadd.f32 %v385_v58, %v1455_v44  ;;  %v452_v58 = vadd.f32 %v451_v57, %v1165_v3  ;;  %v429_v52 = vsub.f32 2.0, %v428_v54  ;;  %v440_v54 = vsub.f32 0.0, %v1515_v49 }
 0x2ed   : > { %v403_v25 = vpop.xlane.xlu1 %402  ;;  %v400_v41 = vpop.xlane.xlu0 %399 }
 0x2ee   : > { %v405_v42 = vmul.f32 %v403_v25, %v1225_v16  ;;  %v404_v62 = vmul.f32 %v400_v41, %v1155_v1  ;;  %v435_v41 = vmul.f32 %v1007_v48, %v434_v55 }
 0x2f0   : > { %v407_v63 = vsel %vm114_vm12, %v405_v42, 0.0  ;;  %v406_v36 = vsel %vm110_vm11, %v404_v62, 0.0 }
 0x2f1   : > { %v408_v37 = vadd.f32 %v407_v63, %v406_v36  ;;  %v453_v63 = vsub.f32 %v452_v58, %v1215_v14  ;;  %v430_v36 = vmul.f32 %v1009_v51, %v429_v52 }
 0x2f3   : > { %v409_v39 = vrot.slane %v408_v37, 4 }
 0x2f5   : > { %v410_v44 = vadd.f32 %v409_v39, %v408_v37  ;;  %v465_v39 = vmul.f32 %v1493_v59, %v1220_v15 }
 0x2f7   : > { %v411_v43 = vrot.slane %v410_v44, 2 }
 0x2f9   : > { %v412_v26 = vadd.f32 %v411_v43, %v410_v44  ;;  %v460_v44 = vsub.f32 %v1506_v40, %v1210_v13 }
 0x2fb   : > { %v413_v50 = vrot.slane %v412_v26, 1  ;;  %v461_v45 = vmul.f32 %v460_v44, %v1205_v12 }
 0x2fd   : > { %v414_v20 = vadd.f32 %v413_v50, %v412_v26 }
 0x2ff   : > { %v417_v56 = vadd.f32 %v414_v20, %v1316_v0 }
 0x301   : > { %v420_v27 = vmul.f32 %v418_v47, %v417_v56 }
 0x303   : > { %v422_v21 = vrot.slane %v420_v27, 3 }
 0x305   : > { %v424_v25 = vadd.f32 %v422_v21, %v416_v18 }
 0x307   : > { %v425_v42 = vadd.f32 %v424_v25, %v1488_v35  ;;  %v441_v62 = vmul.f32 %v435_v41, %v424_v25 }
 0x309   : > { %vm426_vm0 = vcmp.ge.f32.partialorder %v425_v42, %v1510_v46  ;;  %v436_v37 = vsub.f32 %v425_v42, %v1210_v13  ;;  %v442_v26 = vmax.f32 %v441_v62, 0.0 }
 0x30a   : > { %v466_v35 = vsel %vm426_vm0, %v1185_v8, 0.0  ;;  %v1559_v43 = vsel %vm426_vm0, %v453_v63, %v425_v42  ;;  %v456_v5 = vsel %vm426_vm0, %v1190_v9, 0.0 }
 0x30b   : > { %v437_v48 = vmul.f32 %v436_v37, %v430_v36  ;;  %v1564_v50 = vadd.f32 %v466_v35, %v465_v39  ;;  %v1566_v59 = vadd.f32 %v456_v5, %v455_v60  ;;  %v458_v47 = vsub.f32 %v1559_v43, %v1165_v3 }
 0x30c   : > { %v443_v53 = vmin.f32 %v442_v26, 1.0 }
 0x30d   : > { %v438_v20 = vmax.f32 %v437_v48, 0.0  ;;  %v459_v51 = vmul.f32 %v458_v47, %v1200_v11 }
 0x30f   : > { %v439_v56 = vmin.f32 %v438_v20, 1.0  ;;  %v462_v57 = vsub.f32 %v459_v51, %v461_v45 }
 0x311   : > { %v444_v27 = vmul.f32 %v443_v53, %v439_v56  ;;  %v463_v55 = vadd.f32 %v462_v57, %v1506_v40 }
 0x313   : > { %v446_v18 = vrot.slane %v444_v27, 7  ;;  %v1577_v21 = vsel %vm426_vm0, %v1506_v40, %v463_v55 }
 0x314   : > { %v1581_v25 = vadd.f32 %v1577_v21, %v1566_v59 }
 0x315   : > { %v448_v58 = vadd.f32 %v446_v18, %v440_v54 }
 0x316   : > { %v469_v52 = vsub.f32 %v425_v42, %v1581_v25  ;;  %v526_v45 = vsub.f32 %v1581_v25, %v1165_v3 }
 0x317   : > { %v449_v41 = vmul.f32 %v448_v58, %v1353_v19 }
 0x318   : > { %v927_v63 = vmul.f32 -1.442695, %v469_v52 }
 0x319   : > { %v1586_v62 = vadd.f32 %v449_v41, %v1515_v49 }
 0x31a   : > { %1010 = vpow2.f32 %v927_v63 }
 0x31b   : > { %v483_v60 = vrot.slane %v1586_v62, 1 }
 0x31d   : > { %v485_v46 = vadd.f32 %v483_v60, %v1564_v50  ;;  %v513_v60 = vrot.slane %v1170_v4, 4 }
 0x31f   : > { %v486_v40 = vmul.f32 0.5, %v485_v46 }
 0x321   : > { %v490_v36 = vrot.slane %v486_v40, %v1288_v38 }
 0x323   : > { %v492_v37 = vmul.f32 %v1240_v28, %v490_v36  ;;  %v491_v39 = vmul.f32 %v1233_v22, %v490_v36 }
 0x325   : > { %v496_v44 = vsel %vm114_vm12, %v492_v37, 0.0  ;;  %v493_v42 = vsel %vm110_vm11, %v491_v39, 0.0  ;;  %v510_v37 = vsub.f32 %v1165_v3, %v1559_v43 }
 0x326   : > { %497 = vadd.xlane.f32.xlu1 %v496_v44  ;;  %494 = vadd.xlane.f32.xlu0 %v493_v42  ;;  %v546_v44 = vmul.f32 %v458_v47, %v1180_v7  ;;  %v550_v47 = vmul.f32 %v1566_v59, %v1195_v10 }
 0x327   : > { %v1011_v49 = vpop.eup %1010 }
 0x328   : > { %v473_v35 = vadd.f32 1.0, %v1011_v49 }
 0x32a   : > { %1012 = vrcp.f32 %v473_v35 }
 0x32b   : > { %1014 = vrcp.f32 %v526_v45 }
 0x32c   : > { %1016 = vrcp.f32 %v1581_v25 }
 0x337   : > { %v1013_v5 = vpop.eup %1012 }
 0x338   : > { %v479_v26 = vrot.slane %v1013_v5, %v1288_v38  ;;  %v1015_v52 = vpop.eup %1014  ;;  %v511_v5 = vmul.f32 %v510_v37, %v1160_v2 }
 0x339   : > { %v528_v40 = vmul.f32 %v1015_v52, %v526_v45  ;;  %v1017_v36 = vpop.eup %1016 }
 0x33a   : > { %v480_v48 = vmul.f32 %v1246_v30, %v479_v26  ;;  %v523_v35 = vmul.f32 %v1017_v36, %v1581_v25 }
 0x33b   : > { %v529_v49 = vsub.f32 2.0, %v528_v40 }
 0x33c   : > { %v1598_v20 = vadd.f32 %v480_v48, %v1527_v61  ;;  %v547_v48 = vadd.f32 %v546_v44, %v1165_v3  ;;  %v524_v45 = vsub.f32 2.0, %v523_v35  ;;  %v535_v35 = vsub.f32 0.0, %v1586_v62 }
 0x3af   : > { %v498_v51 = vpop.xlane.xlu1 %497  ;;  %v495_v53 = vpop.xlane.xlu0 %494 }
 0x3b0   : > { %v500_v56 = vmul.f32 %v498_v51, %v1225_v16  ;;  %v499_v57 = vmul.f32 %v495_v53, %v1155_v1  ;;  %v530_v53 = vmul.f32 %v1015_v52, %v529_v49 }
 0x3b2   : > { %v502_v27 = vsel %vm114_vm12, %v500_v56, 0.0  ;;  %v501_v55 = vsel %vm110_vm11, %v499_v57, 0.0 }
 0x3b3   : > { %v503_v54 = vadd.f32 %v502_v27, %v501_v55  ;;  %v548_v27 = vsub.f32 %v547_v48, %v1215_v14  ;;  %v525_v55 = vmul.f32 %v1017_v36, %v524_v45 }
 0x3b5   : > { %v504_v18 = vrot.slane %v503_v54, 4 }
 0x3b7   : > { %v505_v61 = vadd.f32 %v504_v18, %v503_v54  ;;  %v560_v18 = vmul.f32 %v1564_v50, %v1220_v15 }
 0x3b9   : > { %v506_v58 = vrot.slane %v505_v61, 2 }
 0x3bb   : > { %v507_v41 = vadd.f32 %v506_v58, %v505_v61  ;;  %v555_v61 = vsub.f32 %v1577_v21, %v1210_v13 }
 0x3bd   : > { %v508_v63 = vrot.slane %v507_v41, 1  ;;  %v556_v40 = vmul.f32 %v555_v61, %v1205_v12 }
 0x3bf   : > { %v509_v46 = vadd.f32 %v508_v63, %v507_v41 }
 0x3c1   : > { %v512_v39 = vadd.f32 %v509_v46, %v1316_v0 }
 0x3c3   : > { %v515_v42 = vmul.f32 %v513_v60, %v512_v39 }
 0x3c5   : > { %v517_v26 = vrot.slane %v515_v42, 4 }
 0x3c7   : > { %v519_v51 = vadd.f32 %v517_v26, %v511_v5 }
 0x3c9   : > { %v520_v56 = vadd.f32 %v519_v51, %v1559_v43  ;;  %v536_v57 = vmul.f32 %v530_v53, %v519_v51 }
 0x3cb   : > { %vm521_vm1 = vcmp.ge.f32.partialorder %v520_v56, %v1581_v25  ;;  %v531_v54 = vsub.f32 %v520_v56, %v1210_v13  ;;  %v537_v41 = vmax.f32 %v536_v57, 0.0 }
 0x3cc   : > { %v561_v43 = vsel %vm521_vm1, %v1185_v8, 0.0  ;;  %v1630_v58 = vsel %vm521_vm1, %v548_v27, %v520_v56  ;;  %v551_v59 = vsel %vm521_vm1, %v1190_v9, 0.0 }
 0x3cd   : > { %v532_v52 = vmul.f32 %v531_v54, %v525_v55  ;;  %v1635_v63 = vadd.f32 %v561_v43, %v560_v18  ;;  %v1637_v50 = vadd.f32 %v551_v59, %v550_v47  ;;  %v553_v60 = vsub.f32 %v1630_v58, %v1165_v3 }
 0x3ce   : > { %v538_v37 = vmin.f32 %v537_v41, 1.0 }
 0x3cf   : > { %v533_v46 = vmax.f32 %v532_v52, 0.0  ;;  %v554_v36 = vmul.f32 %v553_v60, %v1200_v11 }
 0x3d1   : > { %v534_v39 = vmin.f32 %v533_v46, 1.0  ;;  %v557_v44 = vsub.f32 %v554_v36, %v556_v40 }
 0x3d3   : > { %v539_v42 = vmul.f32 %v538_v37, %v534_v39  ;;  %v558_v49 = vadd.f32 %v557_v44, %v1577_v21 }
 0x3d5   : > { %v541_v5 = vrot.slane %v539_v42, 7  ;;  %v1648_v26 = vsel %vm521_vm1, %v1577_v21, %v558_v49 }
 0x3d6   : > { %v1652_v51 = vadd.f32 %v1648_v26, %v1637_v50 }
 0x3d7   : > { %v543_v48 = vadd.f32 %v541_v5, %v535_v35 }
 0x3d8   : > { %v564_v45 = vsub.f32 %v520_v56, %v1652_v51  ;;  %v621_v40 = vsub.f32 %v1652_v51, %v1165_v3 }
 0x3d9   : > { %v544_v53 = vmul.f32 %v543_v48, %v1353_v19 }
 0x3da   : > { %v928_v27 = vmul.f32 -1.442695, %v564_v45 }
 0x3db   : > { %v1657_v57 = vadd.f32 %v544_v53, %v1586_v62 }
 0x3dc   : > { %1018 = vpow2.f32 %v928_v27 }
 0x3dd   : > { %v578_v47 = vrot.slane %v1657_v57, 1 }
 0x3df   : > { %v580_v25 = vadd.f32 %v578_v47, %v1635_v63  ;;  %v608_v47 = vrot.slane %v1170_v4, 3 }
 0x3e1   : > { %v581_v21 = vmul.f32 0.5, %v580_v25 }
 0x3e3   : > { %v585_v55 = vrot.slane %v581_v21, %v1288_v38 }
 0x3e5   : > { %v587_v54 = vmul.f32 %v1240_v28, %v585_v55  ;;  %v586_v18 = vmul.f32 %v1233_v22, %v585_v55 }
 0x3e7   : > { %v591_v61 = vsel %vm114_vm12, %v587_v54, 0.0  ;;  %v588_v56 = vsel %vm110_vm11, %v586_v18, 0.0  ;;  %v605_v54 = vsub.f32 %v1165_v3, %v1630_v58 }
 0x3e8   : > { %592 = vadd.xlane.f32.xlu1 %v591_v61  ;;  %589 = vadd.xlane.f32.xlu0 %v588_v56  ;;  %v641_v61 = vmul.f32 %v553_v60, %v1180_v7  ;;  %v645_v60 = vmul.f32 %v1637_v50, %v1195_v10 }
 0x3e9   : > { %v1019_v62 = vpop.eup %1018 }
 0x3ea   : > { %v568_v43 = vadd.f32 1.0, %v1019_v62 }
 0x3ec   : > { %1020 = vrcp.f32 %v568_v43 }
 0x3ed   : > { %1022 = vrcp.f32 %v621_v40 }
 0x3ee   : > { %1024 = vrcp.f32 %v1652_v51 }
 0x3f9   : > { %v1021_v59 = vpop.eup %1020 }
 0x3fa   : > { %v574_v41 = vrot.slane %v1021_v59, %v1288_v38  ;;  %v1023_v45 = vpop.eup %1022  ;;  %v606_v59 = vmul.f32 %v605_v54, %v1160_v2 }
 0x3fb   : > { %v623_v21 = vmul.f32 %v1023_v45, %v621_v40  ;;  %v1025_v55 = vpop.eup %1024 }
 0x3fc   : > { %v575_v52 = vmul.f32 %v1248_v31, %v574_v41  ;;  %v618_v43 = vmul.f32 %v1025_v55, %v1652_v51 }
 0x3fd   : > { %v624_v62 = vsub.f32 2.0, %v623_v21 }
 0x3fe   : > { %v1669_v46 = vadd.f32 %v575_v52, %v1598_v20  ;;  %v642_v52 = vadd.f32 %v641_v61, %v1165_v3  ;;  %v619_v40 = vsub.f32 2.0, %v618_v43  ;;  %v630_v43 = vsub.f32 0.0, %v1657_v57 }
 0x471   : > { %v593_v36 = vpop.xlane.xlu1 %592  ;;  %v590_v37 = vpop.xlane.xlu0 %589 }
 0x472   : > { %v595_v39 = vmul.f32 %v593_v36, %v1225_v16  ;;  %v594_v44 = vmul.f32 %v590_v37, %v1155_v1  ;;  %v625_v37 = vmul.f32 %v1023_v45, %v624_v62 }
 0x474   : > { %v597_v42 = vsel %vm114_vm12, %v595_v39, 0.0  ;;  %v596_v49 = vsel %vm110_vm11, %v594_v44, 0.0 }
 0x475   : > { %v598_v35 = vadd.f32 %v597_v42, %v596_v49  ;;  %v643_v42 = vsub.f32 %v642_v52, %v1215_v14  ;;  %v620_v49 = vmul.f32 %v1025_v55, %v619_v40 }
 0x477   : > { %v599_v5 = vrot.slane %v598_v35, 4 }
 0x479   : > { %v600_v20 = vadd.f32 %v599_v5, %v598_v35  ;;  %v655_v5 = vmul.f32 %v1635_v63, %v1220_v15 }
 0x47b   : > { %v601_v48 = vrot.slane %v600_v20, 2 }
 0x47d   : > { %v602_v53 = vadd.f32 %v601_v48, %v600_v20  ;;  %v650_v20 = vsub.f32 %v1648_v26, %v1210_v13 }
 0x47f   : > { %v603_v27 = vrot.slane %v602_v53, 1  ;;  %v651_v21 = vmul.f32 %v650_v20, %v1205_v12 }
 0x481   : > { %v604_v25 = vadd.f32 %v603_v27, %v602_v53 }
 0x483   : > { %v607_v18 = vadd.f32 %v604_v25, %v1316_v0 }
 0x485   : > { %v610_v56 = vmul.f32 %v608_v47, %v607_v18 }
 0x487   : > { %v612_v41 = vrot.slane %v610_v56, 5 }
 0x489   : > { %v614_v36 = vadd.f32 %v612_v41, %v606_v59 }
 0x48b   : > { %v615_v39 = vadd.f32 %v614_v36, %v1630_v58  ;;  %v631_v44 = vmul.f32 %v625_v37, %v614_v36 }
 0x48d   : > { %vm616_vm2 = vcmp.ge.f32.partialorder %v615_v39, %v1652_v51  ;;  %v626_v35 = vsub.f32 %v615_v39, %v1210_v13  ;;  %v632_v53 = vmax.f32 %v631_v44, 0.0 }
 0x48e   : > { %v656_v58 = vsel %vm616_vm2, %v1185_v8, 0.0  ;;  %v1701_v48 = vsel %vm616_vm2, %v643_v42, %v615_v39  ;;  %v646_v50 = vsel %vm616_vm2, %v1190_v9, 0.0 }
 0x48f   : > { %v627_v45 = vmul.f32 %v626_v35, %v620_v49  ;;  %v1706_v27 = vadd.f32 %v656_v58, %v655_v5  ;;  %v1708_v63 = vadd.f32 %v646_v50, %v645_v60  ;;  %v648_v47 = vsub.f32 %v1701_v48, %v1165_v3 }
 0x490   : > { %v633_v54 = vmin.f32 %v632_v53, 1.0 }
 0x491   : > { %v628_v25 = vmax.f32 %v627_v45, 0.0  ;;  %v649_v55 = vmul.f32 %v648_v47, %v1200_v11 }
 0x493   : > { %v629_v18 = vmin.f32 %v628_v25, 1.0  ;;  %v652_v61 = vsub.f32 %v649_v55, %v651_v21 }
 0x495   : > { %v634_v56 = vmul.f32 %v633_v54, %v629_v18  ;;  %v653_v62 = vadd.f32 %v652_v61, %v1648_v26 }
 0x497   : > { %v636_v59 = vrot.slane %v634_v56, 7  ;;  %v1719_v41 = vsel %vm616_vm2, %v1648_v26, %v653_v62 }
 0x498   : > { %v1723_v36 = vadd.f32 %v1719_v41, %v1708_v63 }
 0x499   : > { %v638_v52 = vadd.f32 %v636_v59, %v630_v43 }
 0x49a   : > { %v659_v40 = vsub.f32 %v615_v39, %v1723_v36  ;;  %v716_v21 = vsub.f32 %v1723_v36, %v1165_v3 }
 0x49b   : > { %v639_v37 = vmul.f32 %v638_v52, %v1353_v19 }
 0x49c   : > { %v929_v42 = vmul.f32 -1.442695, %v659_v40 }
 0x49d   : > { %v1728_v44 = vadd.f32 %v639_v37, %v1657_v57 }
 0x49e   : > { %1026 = vpow2.f32 %v929_v42 }
 0x49f   : > { %v673_v60 = vrot.slane %v1728_v44, 1 }
 0x4a1   : > { %v675_v51 = vadd.f32 %v673_v60, %v1706_v27  ;;  %v703_v60 = vrot.slane %v1170_v4, 2 }
 0x4a3   : > { %v676_v26 = vmul.f32 0.5, %v675_v51 }
 0x4a5   : > { %v680_v49 = vrot.slane %v676_v26, %v1288_v38 }
 0x4a7   : > { %v682_v35 = vmul.f32 %v1240_v28, %v680_v49  ;;  %v681_v5 = vmul.f32 %v1233_v22, %v680_v49 }
 0x4a9   : > { %v686_v20 = vsel %vm114_vm12, %v682_v35, 0.0  ;;  %v683_v39 = vsel %vm110_vm11, %v681_v5, 0.0  ;;  %v700_v35 = vsub.f32 %v1165_v3, %v1701_v48 }
 0x4aa   : > { %687 = vadd.xlane.f32.xlu1 %v686_v20  ;;  %684 = vadd.xlane.f32.xlu0 %v683_v39  ;;  %v736_v20 = vmul.f32 %v648_v47, %v1180_v7 }
 0x4ab   : > { %v1027_v57 = vpop.eup %1026 }
 0x4ac   : > { %v663_v58 = vadd.f32 1.0, %v1027_v57 }
 0x4ae   : > { %1028 = vrcp.f32 %v663_v58 }
 0x4af   : > { %1030 = vrcp.f32 %v716_v21 }
 0x4b0   : > { %1032 = vrcp.f32 %v1723_v36 }
 0x4bb   : > { %v1029_v50 = vpop.eup %1028 }
 0x4bc   : > { %v669_v53 = vrot.slane %v1029_v50, %v1288_v38  ;;  %v1031_v40 = vpop.eup %1030  ;;  %v701_v50 = vmul.f32 %v700_v35, %v1160_v2 }
 0x4bd   : > { %v718_v26 = vmul.f32 %v1031_v40, %v716_v21  ;;  %v1033_v49 = vpop.eup %1032 }
 0x4be   : > { %v670_v45 = vmul.f32 %v1252_v32, %v669_v53  ;;  %v713_v58 = vmul.f32 %v1033_v49, %v1723_v36 }
 0x4bf   : > { %v719_v57 = vsub.f32 2.0, %v718_v26 }
 0x4c0   : > { %v1740_v25 = vadd.f32 %v670_v45, %v1669_v46  ;;  %v737_v45 = vadd.f32 %v736_v20, %v1165_v3  ;;  %v714_v21 = vsub.f32 2.0, %v713_v58 }
 0x4c2   : > { %v715_v47 = vmul.f32 %v1033_v49, %v714_v21 }
 0x533   : > { %v688_v55 = vpop.xlane.xlu1 %687  ;;  %v685_v54 = vpop.xlane.xlu0 %684 }
 0x534   : > { %v690_v18 = vmul.f32 %v688_v55, %v1225_v16  ;;  %v689_v61 = vmul.f32 %v685_v54, %v1155_v1  ;;  %v720_v54 = vmul.f32 %v1031_v40, %v719_v57  ;;  %v725_v57 = vsub.f32 0.0, %v1728_v44 }
 0x536   : > { %v692_v56 = vsel %vm114_vm12, %v690_v18, 0.0  ;;  %v691_v62 = vsel %vm110_vm11, %v689_v61, 0.0 }
 0x537   : > { %v693_v43 = vadd.f32 %v692_v56, %v691_v62  ;;  %v738_v56 = vsub.f32 %v737_v45, %v1215_v14 }
 0x539   : > { %v694_v59 = vrot.slane %v693_v43, 4 }
 0x53b   : > { %v695_v46 = vadd.f32 %v694_v59, %v693_v43  ;;  %v750_v43 = vmul.f32 %v1706_v27, %v1220_v15  ;;  %v745_v59 = vsub.f32 %v1719_v41, %v1210_v13 }
 0x53d   : > { %v696_v52 = vrot.slane %v695_v46, 2 }
 0x53f   : > { %v697_v37 = vadd.f32 %v696_v52, %v695_v46 }
 0x541   : > { %v698_v42 = vrot.slane %v697_v37, 1 }
 0x543   : > { %v699_v51 = vadd.f32 %v698_v42, %v697_v37 }
 0x545   : > { %v702_v5 = vadd.f32 %v699_v51, %v1316_v0  ;;  %v740_v0 = vmul.f32 %v1708_v63, %v1195_v10  ;;  %v746_v51 = vmul.f32 %v745_v59, %v1205_v12 }
 0x547   : > { %v705_v39 = vmul.f32 %v703_v60, %v702_v5 }
 0x549   : > { %v707_v53 = vrot.slane %v705_v39, 6 }
 0x54b   : > { %v709_v55 = vadd.f32 %v707_v53, %v701_v50 }
 0x54d   : > { %v710_v18 = vadd.f32 %v709_v55, %v1701_v48  ;;  %v726_v61 = vmul.f32 %v720_v54, %v709_v55 }
 0x54f   : > { %vm711_vm3 = vcmp.ge.f32.partialorder %v710_v18, %v1723_v36  ;;  %v721_v62 = vsub.f32 %v710_v18, %v1210_v13  ;;  %v727_v52 = vmax.f32 %v726_v61, 0.0 }
 0x550   : > { %v751_v48 = vsel %vm711_vm3, %v1185_v8, 0.0  ;;  %v1772_v46 = vsel %vm711_vm3, %v738_v56, %v710_v18  ;;  %v741_v63 = vsel %vm711_vm3, %v1190_v9, 0.0 }
 0x551   : > { %v722_v37 = vmul.f32 %v721_v62, %v715_v47  ;;  %v1777_v40 = vadd.f32 %v751_v48, %v750_v43  ;;  %v1779_v27 = vadd.f32 %v741_v63, %v740_v0  ;;  %v743_v42 = vsub.f32 %v1772_v46, %v1165_v3 }
 0x552   : > { %v728_v49 = vmin.f32 %v727_v52, 1.0 }
 0x553   : > { %v723_v60 = vmax.f32 %v722_v37, 0.0  ;;  %v744_v26 = vmul.f32 %v743_v42, %v1200_v11 }
 0x555   : > { %v724_v35 = vmin.f32 %v723_v60, 1.0  ;;  %v747_v5 = vsub.f32 %v744_v26, %v746_v51 }
 0x557   : > { %v729_v20 = vmul.f32 %v728_v49, %v724_v35  ;;  %v748_v39 = vadd.f32 %v747_v5, %v1719_v41 }
 0x559   : > { %v731_v58 = vrot.slane %v729_v20, 7  ;;  %v1790_v50 = vsel %vm711_vm3, %v1719_v41, %v748_v39 }
 0x55a   : > { %v1794_v45 = vadd.f32 %v1790_v50, %v1779_v27 }
 0x55b   : > { %v733_v53 = vadd.f32 %v731_v58, %v725_v57 }
 0x55c   : > { %v754_v54 = vsub.f32 %v710_v18, %v1794_v45  ;;  %v811_v60 = vsub.f32 %v1794_v45, %v1165_v3 }
 0x55d   : > { %v734_v55 = vmul.f32 %v733_v53, %v1353_v19 }
 0x55e   : > { %v930_v61 = vmul.f32 -1.442695, %v754_v54 }
 0x55f   : > { %v1799_v21 = vadd.f32 %v734_v55, %v1728_v44 }
 0x560   : > { %1034 = vpow2.f32 %v930_v61  ;;  %v798_v61 = vrot.slane %v1170_v4, 1 }
 0x561   : > { %v768_v56 = vrot.slane %v1799_v21, 1 }
 0x563   : > { %v770_v36 = vadd.f32 %v768_v56, %v1777_v40 }
 0x565   : > { %v771_v41 = vmul.f32 0.5, %v770_v36 }
 0x567   : > { %v775_v0 = vrot.slane %v771_v41, %v1288_v38 }
 0x569   : > { %v777_v47 = vmul.f32 %v1240_v28, %v775_v0  ;;  %v776_v62 = vmul.f32 %v1233_v22, %v775_v0  ;;  %v795_v0 = vsub.f32 %v1165_v3, %v1772_v46 }
 0x56b   : > { %v781_v43 = vsel %vm114_vm12, %v777_v47, 0.0  ;;  %v778_v18 = vsel %vm110_vm11, %v776_v62, 0.0  ;;  %v1046_v47 = vld [vmem:[%s1312_s26] sm:$0xff] }
 0x56c   : > { %782 = vadd.xlane.f32.xlu1 %v781_v43  ;;  %779 = vadd.xlane.f32.xlu0 %v778_v18  ;;  %v831_v43 = vmul.f32 %v743_v42, %v1180_v7  ;;  %v835_v42 = vmul.f32 %v1779_v27, %v1195_v10 }
 0x56d   : > { %v1035_v44 = vpop.eup %1034 }
 0x56e   : > { %v758_v59 = vadd.f32 1.0, %v1035_v44 }
 0x570   : > { %1036 = vrcp.f32 %v758_v59 }
 0x571   : > { %1038 = vrcp.f32 %v811_v60 }
 0x572   : > { %1040 = vrcp.f32 %v1794_v45 }
 0x57d   : > { %v1037_v48 = vpop.eup %1036 }
 0x57e   : > { %v764_v63 = vrot.slane %v1037_v48, %v1288_v38  ;;  %v1039_v55 = vpop.eup %1038  ;;  %v796_v48 = vmul.f32 %v795_v0, %v1160_v2 }
 0x57f   : > { %v813_v36 = vmul.f32 %v1039_v55, %v811_v60  ;;  %v1041_v41 = vpop.eup %1040 }
 0x580   : > { %v765_v52 = vmul.f32 %v1254_v33, %v764_v63  ;;  %v808_v44 = vmul.f32 %v1041_v41, %v1794_v45 }
 0x581   : > { %v814_v59 = vsub.f32 2.0, %v813_v36 }
 0x582   : > { %v1811_v37 = vadd.f32 %v765_v52, %v1740_v25  ;;  %v832_v52 = vadd.f32 %v831_v43, %v1165_v3 }
 0x583   : > { %v815_v60 = vmul.f32 %v1039_v55, %v814_v59 }
 0x5f5   : > { %v783_v51 = vpop.xlane.xlu1 %782  ;;  %v780_v26 = vpop.xlane.xlu0 %779 }
 0x5f6   : > { %v785_v49 = vmul.f32 %v783_v51, %v1225_v16  ;;  %v784_v35 = vmul.f32 %v780_v26, %v1155_v1  ;;  %v809_v26 = vsub.f32 2.0, %v808_v44  ;;  %v820_v44 = vsub.f32 0.0, %v1799_v21 }
 0x5f8   : > { %v787_v5 = vsel %vm114_vm12, %v785_v49, 0.0  ;;  %v786_v20 = vsel %vm110_vm11, %v784_v35, 0.0 }
 0x5f9   : > { %v788_v39 = vadd.f32 %v787_v5, %v786_v20  ;;  %v833_v5 = vsub.f32 %v832_v52, %v1215_v14  ;;  %v840_v20 = vsub.f32 %v1790_v50, %v1210_v13 }
 0x5fb   : > { %v789_v25 = vrot.slane %v788_v39, 4  ;;  %v841_v36 = vmul.f32 %v840_v20, %v1205_v12 }
 0x5fd   : > { %v790_v57 = vadd.f32 %v789_v25, %v788_v39  ;;  %v810_v39 = vmul.f32 %v1041_v41, %v809_v26 }
 0x5ff   : > { %v791_v58 = vrot.slane %v790_v57, 2 }
 0x601   : > { %v792_v53 = vadd.f32 %v791_v58, %v790_v57  ;;  %v845_v57 = vmul.f32 %v1777_v40, %v1220_v15 }
 0x603   : > { %v793_v54 = vrot.slane %v792_v53, 1 }
 0x605   : > { %v794_v56 = vadd.f32 %v793_v54, %v792_v53 }
 0x607   : > { %v797_v62 = vadd.f32 %v1046_v47, %v794_v56 }
 0x609   : > { %v800_v18 = vmul.f32 %v798_v61, %v797_v62 }
 0x60b   : > { %v802_v63 = vrot.slane %v800_v18, 7 }
 0x60d   : > { %v804_v51 = vadd.f32 %v802_v63, %v796_v48 }
 0x60f   : > { %v805_v49 = vadd.f32 %v804_v51, %v1772_v46  ;;  %v821_v35 = vmul.f32 %v815_v60, %v804_v51 }
 0x611   : > { %vm806_vm4 = vcmp.ge.f32.partialorder %v805_v49, %v1794_v45  ;;  %v816_v25 = vsub.f32 %v805_v49, %v1210_v13  ;;  %v822_v55 = vmax.f32 %v821_v35, 0.0 }
 0x612   : > { %v834_v46 = vsel %vm806_vm4, %v833_v5, %v805_v49   ;;  %v836_v58 = vsel %vm806_vm4, %v1190_v9, 0.0  ;;  %v846_v27 = vsel %vm806_vm4, %v1185_v8, 0.0 }
 0x613   : > { %v817_v53 = vmul.f32 %v816_v25, %v810_v39  ;;  %v837_v54 = vadd.f32 %v836_v58, %v835_v42   ;;  %v838_v61 = vsub.f32 %v834_v46, %v1165_v3  ;;  %v847_v56 = vadd.f32 %v846_v27, %v845_v57   ;;  %865 = vst.msk [vmem:[#allocation2] sm:$0x1] (%p87_p0), %vm864_vm5, %v834_v46 }
 0x614   : > { %v823_v47 = vmin.f32 %v822_v55, 1.0 }
 0x615   : > { %v818_v40 = vmax.f32 %v817_v53, 0.0  ;;  %v839_v41 = vmul.f32 %v838_v61, %v1200_v11  ;;  %v1888_v27 = vmov %v847_v56  ;;  %868 = vst.msk [vmem:[#allocation2 + $0x2] sm:$0x1] (%p87_p0), %vm864_vm5, %v837_v54  ;;  %870 = vst.msk [vmem:[#allocation2 + $0x4] sm:$0x1] (%p87_p0), %vm864_vm5, %v847_v56 }
 0x617   : > { %v819_v0 = vmin.f32 %v818_v40, 1.0  ;;  %v842_v62 = vsub.f32 %v839_v41, %v841_v36 }
 0x619   : > { %v824_v43 = vmul.f32 %v823_v47, %v819_v0  ;;  %v843_v18 = vadd.f32 %v842_v62, %v1790_v50 }
 0x61b   : > { %v826_v59 = vrot.slane %v824_v43, 7  ;;  %v844_v48 = vsel %vm806_vm4, %v1790_v50, %v843_v18  }
 0x61c   : > { %v848_v63 = vadd.f32 %v844_v48, %v837_v54  ;;  %869 = vst.msk [vmem:[#allocation2 + $0x3] sm:$0x1] (%p87_p0), %vm864_vm5, %v844_v48 }
 0x61d   : > { %v828_v52 = vadd.f32 %v826_v59, %v820_v44 }
 0x61e   : > { %v849_v51 = vsub.f32 %v805_v49, %v848_v63 }
 0x61f   : > { %v829_v26 = vmul.f32 %v828_v52, %v1353_v19 }
 0x620   : > { %v931_v60 = vmul.f32 -1.442695, %v849_v51 }
 0x621   : > { %v830_v5 = vadd.f32 %v829_v26, %v1799_v21   ;;  %v1889_v26 = vmov %v844_v48 }
 0x622   : > { %1042 = vpow2.f32 %v931_v60 }
 0x623   :  { %867 = vst.msk [vmem:[#allocation2] sm:$0x2] (%p87_p0), %vm866_vm6, %v830_v5 }
 0x62f   : > { %v1043_v35 = vpop.eup %1042 }
 0x630   : > { %v853_v42 = vadd.f32 1.0, %v1043_v35  ;;  %v1891_v35 = vmov %v830_v5 }
 0x632   : > { %1044 = vrcp.f32 %v853_v42 }
 0x63f   : > { %v1045_v20 = vpop.eup %1044 }
 0x640   : > { %v859_v39 = vrot.slane %v1045_v20, %v1288_v38  ;;  %v1892_v20 = vmov %v834_v46 }
 0x642   : > { %v860_v25 = vmul.f32 %v1257_v34, %v859_v39  ;;  %89 = sbr.rel (!%p87_p0) target bundleno = 13 (0xd), region = 57 }
 0x644   : > { %v861_v50 = vadd.f32 %v860_v25, %v1811_v37  ;;  %v1890_v25 = vmov %v837_v54 }
 0x646   : > { %863 = vst.msk [vmem:[%s862_s28] sm:$0xff] %vm110_vm11, %v861_v50 }
 0x647   :  { %1058 = shalt.err (!%p1055_p5)
}
 0x648   :  { %882 = dma.vmem_to_hbm [thread:$0]  %s880_s30, 128, %s1886_s5, [#allocation3]  }
 0x649   :  { %1091 = dma.done.wait [#allocation3], 128  }
 0x64a   :  { %1092 = vsyncadd [#allocation3], 4294967168 }
 0x64b   :  { %888 = vsyncpa [#allocation3], 1 }

</bundles_post_ra>
